<compile_context>
chip_gen: v5e
topology: v5e:2x2
jax: 0.10.0
libtpu: 0.0.40
codegen_flags: <defaults>
</compile_context>

<pallas_src>
import functools

import jax
import jax.numpy as jnp
from jax.experimental import pallas as pl
from jax.experimental.pallas import tpu as pltpu


_MASK_NEG = -1e30


def _round_up(x, m):
    return ((x + m - 1) // m) * m


def _vmem_capacity_bytes():
    try:
        info = pltpu.get_tpu_info()
        cap = int(getattr(info, "vmem_capacity_bytes", 0))
        if cap > 0:
            return cap
    except Exception:
        pass
    return 128 * 1024 * 1024  # v5e/v6e default if query unavailable


_VMEM_CAP = _vmem_capacity_bytes()


def _nll_rows(cross, e2, p2, lbl, *, distance, c_valid):
    """Per-row NLL.  cross: (R, Cp) f32, e2: (R, 1) f32, p2: (1, Cp) f32,
    lbl: (R, 1) int32.  Returns (R, 1) f32."""
    if distance == "euclidean":
        # torch.cdist(p=2): true euclidean distance (with sqrt), matching spec.
        d2 = jnp.maximum(e2 + p2 - 2.0 * cross, 0.0)
        logits = -jnp.sqrt(d2)
    else:  # cosine: 1 - cross / (||e|| * ||p||);  logits = -(1 - cos)
        inv_e = jax.lax.rsqrt(jnp.maximum(e2, 1e-24))
        inv_p = jax.lax.rsqrt(jnp.maximum(p2, 1e-24))
        logits = cross * inv_e * inv_p - 1.0

    cls = jax.lax.broadcasted_iota(jnp.int32, logits.shape, 1)
    logits = jnp.where(cls < c_valid, logits, _MASK_NEG)      # mask padded classes
    m = jnp.max(logits, axis=1, keepdims=True)
    lse = m + jnp.log(jnp.sum(jnp.exp(logits - m), axis=1, keepdims=True))
    picked = jnp.sum(jnp.where(cls == lbl, logits, 0.0), axis=1, keepdims=True)
    return lse - picked


# ----------------------------------------------------------------------------
# Single-block kernel (whole episode resident in VMEM).
# ----------------------------------------------------------------------------
def _proto_loss_single_kernel(emb_ref, ohtT_ref, lbl_ref, invcnt_ref, loss_ref, *,
                              distance, n_valid, c_valid):
    emb_mm = emb_ref[...]                                         # (Np, Dp) native dtype

    # prototypes: natural (Cp, Np) @ (Np, Dp) MXU shape, f32 accumulation,
    # scaled by the precomputed (Cp, 1) count reciprocals.
    protos = jnp.dot(ohtT_ref[...], emb_mm,
                     preferred_element_type=jnp.float32) * invcnt_ref[...]   # (Cp, Dp)

    # Transpose ONLY the small prototype tile; ||p||^2 via sublane reduce on
    # the transposed tile -> lands directly as a (1, Cp) lane vector.
    protos_t = protos.T                                           # (Dp, Cp) f32
    p2 = jnp.sum(protos_t * protos_t, axis=0, keepdims=True)      # (1, Cp)

    # Single MXU cross matmul shared by both distances.
    cross = jnp.dot(emb_mm, protos_t.astype(emb_mm.dtype),
                    preferred_element_type=jnp.float32)           # (Np, Cp)

    # ||e||^2: f32 upconvert lives only inside the reduction.
    e2 = jnp.sum(jnp.square(emb_mm.astype(jnp.float32)), axis=1, keepdims=True)

    nll = _nll_rows(cross, e2, p2, lbl_ref[...],
                    distance=distance, c_valid=c_valid)           # (Np, 1)

    rows = jax.lax.broadcasted_iota(jnp.int32, nll.shape, 0)
    valid = (rows < n_valid).astype(jnp.float32)                  # mask padded rows
    loss_ref[...] = jnp.sum(nll * valid, keepdims=True) * (1.0 / float(n_valid))


# ----------------------------------------------------------------------------
# N-tiled two-pass kernel (large episodes / v7x 64 MiB VMEM budget).
#   pass 0: accumulate (Cp, Dp) prototype sums over row tiles
#   pass 1: per-tile NLL into the (1, 1) loss accumulator
# ----------------------------------------------------------------------------
def _proto_loss_tiled_kernel(emb_ref, ohtT_ref, lbl_ref, invcnt_ref, loss_ref,
                             proto_acc, protoT_scr, p2_scr, *,
                             distance, n_valid, c_valid, row_tile):
    p = pl.program_id(0)   # 0: prototype accumulation, 1: NLL
    t = pl.program_id(1)   # row tile

    @pl.when((p == 0) & (t == 0))
    def _():
        proto_acc[...] = jnp.zeros_like(proto_acc)
        loss_ref[...] = jnp.zeros_like(loss_ref)

    @pl.when(p == 0)
    def _():
        # (Cp, TM) @ (TM, Dp) -> accumulate class sums in f32.
        proto_acc[...] += jnp.dot(ohtT_ref[...], emb_ref[...],
                                  preferred_element_type=jnp.float32)

    @pl.when((p == 1) & (t == 0))
    def _():
        protos = proto_acc[...] * invcnt_ref[...]                 # (Cp, Dp) f32 means
        protos_t = protos.T                                       # (Dp, Cp) f32
        p2_scr[...] = jnp.sum(protos_t * protos_t, axis=0, keepdims=True)
        protoT_scr[...] = protos_t.astype(protoT_scr.dtype)       # MXU operand dtype

    @pl.when(p == 1)
    def _():
        emb_mm = emb_ref[...]                                     # (TM, Dp)
        cross = jnp.dot(emb_mm, protoT_scr[...],
                        preferred_element_type=jnp.float32)       # (TM, Cp)
        e2 = jnp.sum(jnp.square(emb_mm.astype(jnp.float32)), axis=1, keepdims=True)
        nll = _nll_rows(cross, e2, p2_scr[...], lbl_ref[...],
                        distance=distance, c_valid=c_valid)       # (TM, 1)
        rows = t * row_tile + jax.lax.broadcasted_iota(jnp.int32, nll.shape, 0)
        valid = (rows < n_valid).astype(jnp.float32)
        loss_ref[...] += jnp.sum(nll * valid, keepdims=True) * (1.0 / float(n_valid))


# ----------------------------------------------------------------------------
# Wrapper (hot path, jitted; no host syncs).
# ----------------------------------------------------------------------------
@functools.partial(jax.jit,
                   static_argnames=("num_classes", "distance", "force_tiled",
                                    "row_tile"))
def prototypical_loss(embeddings, labels_idx, *, num_classes,
                      distance="euclidean", force_tiled=False, row_tile=512):
    """embeddings (N, D); labels_idx (N,) int in [0, num_classes).

    `num_classes` must be a static Python int (use remap_labels once per
    episode if labels are arbitrary values).  Every class in [0, num_classes)
    is assumed to appear at least once (as torch.unique guarantees); an empty
    class would get a zero prototype that still participates in the softmax.
    """
    assert distance in ("euclidean", "cosine")
    assert row_tile > 0 and row_tile % 128 == 0
    N, D = embeddings.shape
    C = int(num_classes)

    dt = embeddings.dtype
    isz = jnp.dtype(dt).itemsize

    # Lane-dense padding: everything to multiples of 128 (N is the lane axis of
    # the transposed one-hot; 128 also covers bf16's 16-row sublane packing).
    Dp = _round_up(max(D, 128), 128)
    Cp = _round_up(max(C, 128), 128)
    Np0 = _round_up(max(N, 128), 128)

    # ---- capacity-driven path choice (single block vs. N-tiled two-pass) ----
    bytes_in_single = Np0 * Dp * isz + Cp * Np0 * isz + Np0 * 4 + Cp * 4
    bytes_tmp_single = (2 * Cp * Dp * 4 + Cp * Dp * isz      # protos, protos.T, cast
                        + 6 * Np0 * Cp * 4                   # cross / logits / exp temps
                        + 2 * Np0 * 4 + 2 * Cp * 4)
    est_single = bytes_in_single + bytes_tmp_single + (2 << 20)
    # ~48 MiB usable on v7x (64 MiB/TC), ~102 MiB on v5e/v6e (128 MiB).
    usable_single = min(_VMEM_CAP - (16 << 20), int(0.8 * _VMEM_CAP))
    use_tiled = bool(force_tiled) or est_single > usable_single

    Np = _round_up(max(N, row_tile), row_tile) if use_tiled else Np0

    # ---- padded inputs (one-hot built already transposed: no XLA transpose) --
    emb_pad = jnp.zeros((Np, Dp), dt).at[:N, :D].set(embeddings)
    lbl = labels_idx.astype(jnp.int32)
    cls_iota = jnp.arange(Cp, dtype=jnp.int32)[:, None]                  # (Cp, 1)
    oht = cls_iota == lbl[None, :]                                       # (Cp, N) bool
    counts = jnp.sum(oht, axis=1, dtype=jnp.float32)[:, None]            # (Cp, 1)
    inv_counts = 1.0 / jnp.maximum(counts, 1.0)                          # (Cp, 1) f32
    ohtT_pad = jnp.zeros((Cp, Np), dt).at[:, :N].set(oht.astype(dt))     # (Cp, Np)
    lbl_pad = jnp.zeros((Np, 1), jnp.int32).at[:N, 0].set(lbl)           # (Np, 1)

    # Scheduling hint for XLA around the custom call.
    flops = 4 * Np * Dp * Cp + 8 * Np * Cp
    bytes_accessed = Np * Dp * isz + Cp * Np * isz + Np * 4 + Cp * 4 + 4
    if use_tiled:
        bytes_accessed += Np * Dp * isz + Cp * Np * isz   # pass 2 re-reads
    cost = pl.CostEstimate(flops=int(flops), transcendentals=int(Np * Cp),
                           bytes_accessed=int(bytes_accessed))

    if not use_tiled:
        vmem_limit = int(min(_VMEM_CAP - (8 << 20),
                             max(32 << 20, est_single + (8 << 20))))
        kernel = functools.partial(_proto_loss_single_kernel,
                                   distance=distance, n_valid=N, c_valid=C)
        loss = pl.pallas_call(
            kernel,
            out_shape=jax.ShapeDtypeStruct((1, 1), jnp.float32),
            in_specs=[pl.BlockSpec(memory_space=pltpu.MemorySpace.VMEM)] * 4,
            out_specs=pl.BlockSpec(memory_space=pltpu.MemorySpace.VMEM),
            compiler_params=pltpu.CompilerParams(vmem_limit_bytes=vmem_limit),
            cost_estimate=cost,
        )(emb_pad, ohtT_pad, lbl_pad, inv_counts)
        return loss[0, 0]

    # ------------------------------ tiled path -------------------------------
    TM = row_tile
    n_tiles = Np // TM
    bytes_in_tile = TM * Dp * isz + Cp * TM * isz + TM * 4 + Cp * 4
    bytes_scratch = Cp * Dp * 4 + Dp * Cp * isz + 8 * Cp * 4
    bytes_tmp_tile = TM * Dp * 4 + 6 * TM * Cp * 4 + 2 * Cp * Dp * 4
    est_tiled = 2 * bytes_in_tile + bytes_scratch + bytes_tmp_tile + (2 << 20)
    assert est_tiled <= _VMEM_CAP - (8 << 20), (
        "episode too large even for the tiled kernel; lower row_tile or split "
        "the class/feature dimensions")
    vmem_limit = int(min(_VMEM_CAP - (8 << 20),
                         max(32 << 20, est_tiled + (8 << 20))))

    kernel = functools.partial(_proto_loss_tiled_kernel, distance=distance,
                               n_valid=N, c_valid=C, row_tile=TM)
    # TODO(synk): split into two pallas_calls so the NLL pass's row axis can be
    # marked "parallel" for v7x's 2 TensorCores (prototype pass stays serial).
    loss = pl.pallas_call(
        kernel,
        out_shape=jax.ShapeDtypeStruct((1, 1), jnp.float32),
        grid_spec=pltpu.PrefetchScalarGridSpec(
            num_scalar_prefetch=0,
            grid=(2, n_tiles),
            in_specs=[
                pl.BlockSpec((TM, Dp), lambda p, t: (t, 0)),   # embeddings
                pl.BlockSpec((Cp, TM), lambda p, t: (0, t)),   # transposed one-hot
                pl.BlockSpec((TM, 1), lambda p, t: (t, 0)),    # label column
                pl.BlockSpec((Cp, 1), lambda p, t: (0, 0)),    # 1 / class counts
            ],
            out_specs=pl.BlockSpec((1, 1), lambda p, t: (0, 0)),
            scratch_shapes=[
                pltpu.VMEM((Cp, Dp), jnp.float32),  # prototype sums / means
                pltpu.VMEM((Dp, Cp), dt),           # transposed protos (MXU operand)
                pltpu.VMEM((1, Cp), jnp.float32),   # ||p||^2
            ]),
        compiler_params=pltpu.CompilerParams(
            dimension_semantics=("arbitrary", "arbitrary"),
            vmem_limit_bytes=vmem_limit),
        cost_estimate=cost,
    )(emb_pad, ohtT_pad, lbl_pad, inv_counts)
    return loss[0, 0]


def remap_labels(labels):
    """One-time (per episode) remap of arbitrary labels to [0, C).  Forces a
    device->host sync for the static class count; keep OUT of the hot path."""
    classes, labels_idx = jnp.unique(labels, return_inverse=True)
    return labels_idx.astype(jnp.int32), int(classes.shape[0])


def _reference(embeddings, labels, distance="euclidean"):
    classes, idx = jnp.unique(labels, return_inverse=True)
    C = int(classes.shape[0])
    oh = jax.nn.one_hot(idx, C, dtype=jnp.float32)
    counts = oh.sum(0)[:, None]
    protos = (oh.T @ embeddings.astype(jnp.float32)) / counts
    if distance == "euclidean":
        diff = embeddings[:, None, :].astype(jnp.float32) - protos[None, :, :]
        dists = jnp.sqrt(jnp.maximum(jnp.sum(diff * diff, axis=-1), 0.0))
    else:
        e = embeddings.astype(jnp.float32)
        e = e / jnp.maximum(jnp.linalg.norm(e, axis=1, keepdims=True), 1e-12)
        p = protos / jnp.maximum(jnp.linalg.norm(protos, axis=1, keepdims=True), 1e-12)
        dists = 1.0 - e @ p.T
    logp = jax.nn.log_softmax(-dists, axis=1)
    return -jnp.mean(logp[jnp.arange(embeddings.shape[0]), idx])


if __name__ == "__main__":
    key = jax.random.PRNGKey(0)
    k1, k2, k3, k4, k5, k6 = jax.random.split(key, 6)

    # 1) small f32 episode -> single-block path
    emb_small = jax.random.normal(k1, (16, 32), dtype=jnp.float32)
    lab_small = jax.random.randint(k2, (16,), 0, 4)
    idx_small, c_small = remap_labels(lab_small)

    # 2) larger f32 episode, tiled two-pass path forced (3 row tiles of 128)
    emb_big = jax.random.normal(k3, (300, 64), dtype=jnp.float32)
    lab_big = jax.random.randint(k4, (300,), 0, 5)
    idx_big, c_big = remap_labels(lab_big)

    # 3) bf16 episode (native-dtype MXU operands), looser tolerance
    emb_bf = jax.random.normal(k5, (64, 128), dtype=jnp.float32).astype(jnp.bfloat16)
    lab_bf = jax.random.randint(k6, (64,), 0, 8)
    idx_bf, c_bf = remap_labels(lab_bf)

    for distance in ("euclidean", "cosine"):
        loss = prototypical_loss(emb_small, idx_small, num_classes=c_small,
                                 distance=distance)
        jax.block_until_ready(loss)
        ref = _reference(emb_small, lab_small, distance=distance)
        assert jnp.isfinite(loss), (distance, "single", loss)
        assert jnp.allclose(loss, ref, atol=1e-3, rtol=1e-3), (distance, "single", loss, ref)

        loss_t = prototypical_loss(emb_big, idx_big, num_classes=c_big,
                                   distance=distance, force_tiled=True, row_tile=128)
        jax.block_until_ready(loss_t)
        ref_t = _reference(emb_big, lab_big, distance=distance)
        assert jnp.isfinite(loss_t), (distance, "tiled", loss_t)
        assert jnp.allclose(loss_t, ref_t, atol=1e-3, rtol=1e-3), (distance, "tiled", loss_t, ref_t)

        loss_b = prototypical_loss(emb_bf, idx_bf, num_classes=c_bf,
                                   distance=distance)
        jax.block_until_ready(loss_b)
        ref_b = _reference(emb_bf, lab_bf, distance=distance)
        assert jnp.isfinite(loss_b), (distance, "bf16", loss_b)
        assert jnp.allclose(loss_b, ref_b, atol=1e-1, rtol=1e-1), (distance, "bf16", loss_b, ref_b)

    print("KERNEL_OK")
</pallas_src>

<mosaic_0001>
module attributes {stable_mosaic.version = 11 : i64} {
  func.func @_proto_loss_single_kernel(%arg0: memref<128x128xf32, #tpu.memory_space<vmem>>, %arg1: memref<128x128xf32, #tpu.memory_space<vmem>>, %arg2: memref<128x1xi32, #tpu.memory_space<vmem>>, %arg3: memref<128x1xf32, #tpu.memory_space<vmem>>, %arg4: memref<1x1xf32, #tpu.memory_space<vmem>>) attributes {dimension_semantics = [], scalar_prefetch = 0 : i64, scratch_operands = 0 : i64, tpu.core_type = #tpu.core_type<tc>} {
    %c0 = arith.constant 0 : index
    %c0_0 = arith.constant 0 : index
    %0 = vector.load %arg0[%c0, %c0_0] : memref<128x128xf32, #tpu.memory_space<vmem>>, vector<128x128xf32>
    %c0_1 = arith.constant 0 : index
    %c0_2 = arith.constant 0 : index
    %1 = vector.load %arg1[%c0_1, %c0_2] : memref<128x128xf32, #tpu.memory_space<vmem>>, vector<128x128xf32>
    %cst = arith.constant dense<0.000000e+00> : vector<128x128xf32>
    %2 = tpu.matmul %1, %0, %cst {dimension_numbers = #tpu.dot_dimension_numbers<[1], [0], [0], [1], [0, 0, 1, 1], [], []>} : vector<128x128xf32>, vector<128x128xf32>, vector<128x128xf32> -> vector<128x128xf32>
    %c0_3 = arith.constant 0 : index
    %c0_4 = arith.constant 0 : index
    %3 = vector.load %arg3[%c0_3, %c0_4] : memref<128x1xf32, #tpu.memory_space<vmem>>, vector<128x1xf32>
    %4 = vector.broadcast %3 : vector<128x1xf32> to vector<128x128xf32>
    %5 = arith.mulf %2, %4 : vector<128x128xf32>
    %6 = tpu.transpose %5, [1, 0] : vector<128x128xf32> -> vector<128x128xf32>
    %7 = arith.mulf %6, %6 : vector<128x128xf32>
    %cst_5 = arith.constant dense<0.000000e+00> : vector<128xf32>
    %8 = vector.multi_reduction <add>, %7, %cst_5 [0] : vector<128x128xf32> to vector<128xf32>
    %9 = vector.shape_cast %8 : vector<128xf32> to vector<1x128xf32>
    %cst_6 = arith.constant dense<0.000000e+00> : vector<128x128xf32>
    %10 = tpu.matmul %0, %6, %cst_6 {dimension_numbers = #tpu.dot_dimension_numbers<[1], [0], [0], [1], [0, 0, 1, 1], [], []>} : vector<128x128xf32>, vector<128x128xf32>, vector<128x128xf32> -> vector<128x128xf32>
    %11 = arith.mulf %0, %0 : vector<128x128xf32>
    %cst_7 = arith.constant dense<0.000000e+00> : vector<128xf32>
    %12 = vector.multi_reduction <add>, %11, %cst_7 [1] : vector<128x128xf32> to vector<128xf32>
    %13 = vector.shape_cast %12 : vector<128xf32> to vector<128x1xf32>
    %c0_8 = arith.constant 0 : index
    %c0_9 = arith.constant 0 : index
    %14 = vector.load %arg2[%c0_8, %c0_9] : memref<128x1xi32, #tpu.memory_space<vmem>>, vector<128x1xi32>
    %15 = vector.broadcast %13 : vector<128x1xf32> to vector<128x128xf32>
    %16 = vector.broadcast %9 : vector<1x128xf32> to vector<128x128xf32>
    %17 = arith.addf %15, %16 : vector<128x128xf32>
    %cst_10 = arith.constant 2.000000e+00 : f32
    %18 = vector.broadcast %cst_10 : f32 to vector<128x128xf32>
    %19 = arith.mulf %18, %10 : vector<128x128xf32>
    %20 = arith.subf %17, %19 : vector<128x128xf32>
    %cst_11 = arith.constant 0.000000e+00 : f32
    %21 = vector.broadcast %cst_11 : f32 to vector<128x128xf32>
    %22 = arith.maximumf %20, %21 : vector<128x128xf32>
    %23 = math.sqrt %22 : vector<128x128xf32>
    %cst_12 = arith.constant 0.000000e+00 : f32
    %24 = vector.broadcast %cst_12 : f32 to vector<128x128xf32>
    %25 = arith.subf %24, %23 : vector<128x128xf32>
    %26 = tpu.iota {dimensions = array<i32: 1>} : vector<128x128xi32>
    %c4_i32 = arith.constant 4 : i32
    %27 = vector.broadcast %c4_i32 : i32 to vector<128x128xi32>
    %28 = arith.cmpi slt, %26, %27 : vector<128x128xi32>
    %cst_13 = arith.constant -1.000000e+30 : f32
    %29 = vector.broadcast %cst_13 : f32 to vector<128x128xf32>
    %30 = arith.select %28, %25, %29 : vector<128x128xi1>, vector<128x128xf32>
    %cst_14 = arith.constant dense<0xFF800000> : vector<128xf32>
    %31 = vector.multi_reduction <maximumf>, %30, %cst_14 [1] : vector<128x128xf32> to vector<128xf32>
    %32 = vector.shape_cast %31 : vector<128xf32> to vector<128x1xf32>
    %33 = vector.broadcast %32 : vector<128x1xf32> to vector<128x128xf32>
    %34 = arith.subf %30, %33 : vector<128x128xf32>
    %35 = math.exp %34 : vector<128x128xf32>
    %cst_15 = arith.constant dense<0.000000e+00> : vector<128xf32>
    %36 = vector.multi_reduction <add>, %35, %cst_15 [1] : vector<128x128xf32> to vector<128xf32>
    %37 = vector.shape_cast %36 : vector<128xf32> to vector<128x1xf32>
    %38 = math.log %37 : vector<128x1xf32>
    %39 = arith.addf %32, %38 : vector<128x1xf32>
    %40 = vector.broadcast %14 : vector<128x1xi32> to vector<128x128xi32>
    %41 = arith.cmpi eq, %26, %40 : vector<128x128xi32>
    %cst_16 = arith.constant 0.000000e+00 : f32
    %42 = vector.broadcast %cst_16 : f32 to vector<128x128xf32>
    %43 = arith.select %41, %30, %42 : vector<128x128xi1>, vector<128x128xf32>
    %cst_17 = arith.constant dense<0.000000e+00> : vector<128xf32>
    %44 = vector.multi_reduction <add>, %43, %cst_17 [1] : vector<128x128xf32> to vector<128xf32>
    %45 = vector.shape_cast %44 : vector<128xf32> to vector<128x1xf32>
    %46 = arith.subf %39, %45 : vector<128x1xf32>
    %47 = tpu.iota {dimensions = array<i32: 0>} : vector<128x1xi32>
    %c16_i32 = arith.constant 16 : i32
    %48 = vector.broadcast %c16_i32 : i32 to vector<128x1xi32>
    %49 = arith.cmpi slt, %47, %48 : vector<128x1xi32>
    %50 = arith.extui %49 : vector<128x1xi1> to vector<128x1xi32>
    %51 = arith.sitofp %50 : vector<128x1xi32> to vector<128x1xf32>
    %52 = arith.mulf %46, %51 : vector<128x1xf32>
    %53 = vector.shape_cast %52 : vector<128x1xf32> to vector<1x128x1xf32>
    %cst_18 = arith.constant dense<0.000000e+00> : vector<1xf32>
    %54 = vector.multi_reduction <add>, %53, %cst_18 [1, 2] : vector<1x128x1xf32> to vector<1xf32>
    %55 = vector.shape_cast %54 : vector<1xf32> to vector<1x1x1xf32>
    %56 = vector.extract %55[0, 0, 0] : f32 from vector<1x1x1xf32>
    %57 = vector.broadcast %56 : f32 to vector<1x1xf32>
    %cst_19 = arith.constant 6.250000e-02 : f32
    %58 = vector.broadcast %cst_19 : f32 to vector<1x1xf32>
    %59 = arith.mulf %57, %58 : vector<1x1xf32>
    %c0_20 = arith.constant 0 : index
    %c0_21 = arith.constant 0 : index
    %60 = vector.load %arg4[%c0_20, %c0_21] : memref<1x1xf32, #tpu.memory_space<vmem>>, vector<1x1xf32>
    tpu.vector_store %arg4[%c0_20, %c0_21], %59 {strides = array<i32>} : memref<1x1xf32, #tpu.memory_space<vmem>>, vector<1x1xf32>,
    return
  }
}

</mosaic_0001>

<bundles_post_ra>
// kernel: prototypical_loss.1
= control target key start
LH: loop header
LB: loop body
LE: loop exit
PB: predicated region body
PF: predicated region fallthrough
CT: control target
= control target key end

     0   :  { %v1307_v3 = vmov 0   ;;  %s2175_s0 = inlined_call_operand.vmem [shape: f32[128,128], index: 0, kind: input, shape index: {}]   ;;  %s2176_s1 = inlined_call_operand.vmem [shape: f32[128,128], index: 1, kind: input, shape index: {}]   ;;  %s2177_s2 = inlined_call_operand.vmem [shape: s32[128,1], index: 2, kind: input, shape index: {}]   ;;  %s2178_s3 = inlined_call_operand.vmem [shape: f32[128,1], index: 3, kind: input, shape index: {}]   ;;  %s2179_s4 = inlined_call_operand.hbm [shape: f32[1,1], index: 4, kind: output, shape index: {}]  }
   0x1   :  { %v1337_v0 = vld [vmem:[%s2175_s0 + $0x78] sm:$0xff]  ;;  %v119_v1 = vld [vmem:[%s2178_s3 + $0x20] sm:$0xff]  ;;  %1184 = vset.pattern.permute.xlu2 %v1307_v3  ;;  %1182 = vset.pattern.permute.xlu0 %v1307_v3  ;;  %v1348_v4 = vld [vmem:[%s2175_s0 + $0x70] sm:$0xff] }
   0x2   :  { %v115_v2 = vld [vmem:[%s2178_s3] sm:$0xff]  ;;  %50 = vmatpush.msra.mxu0 %v1337_v0  ;;  %1146 = vmatpush.msra.mxu2 %v1337_v0  ;;  %v1355_v5 = vld [vmem:[%s2175_s0 + $0x68] sm:$0xff]  ;;  %v1369_v7 = vld [vmem:[%s2175_s0 + $0x58] sm:$0xff] }
   0x3   :  { %153 = vperm.xlu2 %1184, %v119_v1   ;;  %133 = vperm.xlu0 %1182, %v115_v2   ;;  %v1362_v6 = vld [vmem:[%s2175_s0 + $0x60] sm:$0xff]  ;;  %v117_v8 = vld [vmem:[%s2178_s3 + $0x10] sm:$0xff]  ;;  %v120_v9 = vld [vmem:[%s2178_s3 + $0x28] sm:$0xff] }
   0x4   :  { %51 = vmatpush.msra.mxu0 %v1348_v4  ;;  %1147 = vmatpush.msra.mxu2 %v1348_v4  ;;  %v116_v10 = vld [vmem:[%s2178_s3 + $0x8] sm:$0xff]  ;;  %v1385_v11 = vld [vmem:[%s2175_s0 + $0x50] sm:$0xff] }
   0x5   :  { %1183 = vset.pattern.permute.xlu1 %v1307_v3  ;;  %v1392_v12 = vld [vmem:[%s2175_s0 + $0x48] sm:$0xff] }
   0x6   :  { %52 = vmatpush.msra.mxu0 %v1355_v5  ;;  %1148 = vmatpush.msra.mxu2 %v1355_v5 }
   0x7   :  { %143 = vperm.xlu1 %1183, %v117_v8  }
   0x8   :  { %53 = vmatpush.msra.mxu0 %v1362_v6  ;;  %1149 = vmatpush.msra.mxu2 %v1362_v6 }
   0xa   :  { %54 = vmatpush.msra.mxu0 %v1369_v7  ;;  %1150 = vmatpush.msra.mxu2 %v1369_v7 }
   0xb   :  { %158 = vperm.xlu2 %1184, %v120_v9   ;;  %138 = vperm.xlu0 %1182, %v116_v10  }
   0xc   :  { %9 = vsyncpa [#allocation3], 0  ;;  %55 = vmatpush.msra.mxu0 %v1385_v11  ;;  %1151 = vmatpush.msra.mxu2 %v1385_v11  ;;  %v1399_v13 = vld [vmem:[%s2175_s0 + $0x40] sm:$0xff]  ;;  %v118_v14 = vld [vmem:[%s2178_s3 + $0x18] sm:$0xff]  ;;  %v370_v58 = vmul.f32 %v1392_v12, %v1392_v12  ;;  %v371_v59 = vmul.f32 %v1385_v11, %v1385_v11  ;;  %v372_v60 = vmul.f32 %v1369_v7, %v1369_v7  ;;  %s1137_s9 = sshll.u32 %s2179_s4, 4  ;;  %s1138_s9 = int_to_ptr.hbm [resolvable:$true] %s1137_s9 }
   0xd   :  { %v1409_v15 = vld [vmem:[%s2175_s0 + $0x38] sm:$0xff]  ;;  %v123_v16 = vld [vmem:[%s2178_s3 + $0x40] sm:$0xff]  ;;  %v121_v17 = vld [vmem:[%s2178_s3 + $0x30] sm:$0xff]  ;;  %v369_v57 = vmul.f32 %v1399_v13, %v1399_v13  ;;  %v373_v61 = vmul.f32 %v1362_v6, %v1362_v6  ;;  %v374_v62 = vmul.f32 %v1355_v5, %v1355_v5  ;;  %v375_v63 = vmul.f32 %v1348_v4, %v1348_v4 }
   0xe   :  { %56 = vmatpush.msra.mxu0 %v1392_v12  ;;  %1152 = vmatpush.msra.mxu2 %v1392_v12  ;;  %v1422_v18 = vld [vmem:[%s2175_s0 + $0x30] sm:$0xff]  ;;  %v1429_v19 = vld [vmem:[%s2175_s0 + $0x28] sm:$0xff]  ;;  %v1436_v20 = vld [vmem:[%s2175_s0 + $0x20] sm:$0xff]  ;;  %v368_v56 = vmul.f32 %v1409_v15, %v1409_v15  ;;  %v376_v1 = vmul.f32 %v1337_v0, %v1337_v0 }
   0xf   :  { %148 = vperm.xlu1 %1183, %v118_v14   ;;  %v122_v21 = vld [vmem:[%s2178_s3 + $0x38] sm:$0xff]  ;;  %v124_v24 = vld [vmem:[%s2178_s3 + $0x48] sm:$0xff]  ;;  %v1459_v25 = vld [vmem:[%s2175_s0 + $0x10] sm:$0xff]  ;;  %v365_v53 = vmul.f32 %v1436_v20, %v1436_v20  ;;  %v366_v54 = vmul.f32 %v1429_v19, %v1429_v19  ;;  %v367_v55 = vmul.f32 %v1422_v18, %v1422_v18 }
  0x10   :  { %57 = vmatpush.msra.mxu0 %v1399_v13  ;;  %1153 = vmatpush.msra.mxu2 %v1399_v13  ;;  %v1446_v22 = vld [vmem:[%s2175_s0 + $0x18] sm:$0xff]  ;;  %v1466_v26 = vld [vmem:[%s2175_s0 + $0x8] sm:$0xff]  ;;  %v1473_v27 = vld [vmem:[%s2175_s0] sm:$0xff]  ;;  %v363_v48 = vmul.f32 %v1459_v25, %v1459_v25 }
  0x11   :  { %v126_v23 = vld [vmem:[%s2178_s3 + $0x58] sm:$0xff]  ;;  %v34_v28 = vld [vmem:[%s2176_s1] sm:$0xff]  ;;  %v125_v30 = vld [vmem:[%s2178_s3 + $0x50] sm:$0xff]  ;;  %v361_v45 = vmul.f32 %v1473_v27, %v1473_v27  ;;  %v362_v49 = vmul.f32 %v1466_v26, %v1466_v26  ;;  %v364_v52 = vmul.f32 %v1446_v22, %v1446_v22 }
  0x12   :  { %58 = vmatpush.msra.mxu0 %v1409_v15  ;;  %1154 = vmatpush.msra.mxu2 %v1409_v15  ;;  %v42_v29 = vld [vmem:[%s2176_s1 + $0x40] sm:$0xff]  ;;  %v129_v31 = vld [vmem:[%s2178_s3 + $0x70] sm:$0xff]  ;;  %v35_v33 = vld [vmem:[%s2176_s1 + $0x8] sm:$0xff] }
  0x13   :  { %173 = vperm.xlu2 %1184, %v123_v16   ;;  %163 = vperm.xlu0 %1182, %v121_v17   ;;  %v127_v32 = vld [vmem:[%s2178_s3 + $0x60] sm:$0xff]  ;;  %v43_v34 = vld [vmem:[%s2176_s1 + $0x48] sm:$0xff]  ;;  %v130_v36 = vld [vmem:[%s2178_s3 + $0x78] sm:$0xff] }
  0x14   :  { %59 = vmatpush.msra.mxu0 %v1422_v18  ;;  %1155 = vmatpush.msra.mxu2 %v1422_v18  ;;  %v128_v35 = vld [vmem:[%s2178_s3 + $0x68] sm:$0xff]  ;;  %v36_v37 = vld [vmem:[%s2176_s1 + $0x10] sm:$0xff]  ;;  %v37_v39 = vld [vmem:[%s2176_s1 + $0x18] sm:$0xff] }
  0x15   :  { %v44_v38 = vld [vmem:[%s2176_s1 + $0x50] sm:$0xff]  ;;  %v45_v40 = vld [vmem:[%s2176_s1 + $0x58] sm:$0xff]  ;;  %v38_v41 = vld [vmem:[%s2176_s1 + $0x20] sm:$0xff] }
  0x16   :  { %60 = vmatpush.msra.mxu0 %v1429_v19  ;;  %1156 = vmatpush.msra.mxu2 %v1429_v19  ;;  %v46_v42 = vld [vmem:[%s2176_s1 + $0x60] sm:$0xff]  ;;  %v39_v43 = vld [vmem:[%s2176_s1 + $0x28] sm:$0xff]  ;;  %v40_v46 = vld [vmem:[%s2176_s1 + $0x30] sm:$0xff] }
  0x17   :  { %168 = vperm.xlu1 %1183, %v122_v21   ;;  %v47_v44 = vld [vmem:[%s2176_s1 + $0x68] sm:$0xff]  ;;  %v48_v47 = vld [vmem:[%s2176_s1 + $0x70] sm:$0xff]  ;;  %v41_v50 = vld [vmem:[%s2176_s1 + $0x38] sm:$0xff] }
  0x18   :  { %61 = vmatpush.msra.mxu0 %v1436_v20  ;;  %1157 = vmatpush.msra.mxu2 %v1436_v20  ;;  %v49_v51 = vld [vmem:[%s2176_s1 + $0x78] sm:$0xff]  ;;  %v409_v2 = vld [vmem:[%s2177_s2] sm:$0xff]  ;;  %v410_v14 = vld [vmem:[%s2177_s2 + $0x8] sm:$0xff] }
  0x19   :  { %v412_v9 = vld [vmem:[%s2177_s2 + $0x18] sm:$0xff]  ;;  %v414_v21 = vld [vmem:[%s2177_s2 + $0x28] sm:$0xff] }
  0x1a   :  { %62 = vmatpush.msra.mxu0 %v1446_v22  ;;  %1158 = vmatpush.msra.mxu2 %v1446_v22 }
  0x1b   :  { %188 = vperm.xlu2 %1184, %v126_v23   ;;  %178 = vperm.xlu0 %1182, %v124_v24   ;;  %v413_v24 = vld [vmem:[%s2177_s2 + $0x20] sm:$0xff] }
  0x1c   :  { %63 = vmatpush.msra.mxu0 %v1459_v25  ;;  %1159 = vmatpush.msra.mxu2 %v1459_v25 }
  0x1e   :  { %64 = vmatpush.msra.mxu0 %v1466_v26  ;;  %1160 = vmatpush.msra.mxu2 %v1466_v26 }
  0x1f   :  { %183 = vperm.xlu1 %1183, %v125_v30   ;;  %v416_v30 = vld [vmem:[%s2177_s2 + $0x38] sm:$0xff] }
  0x20   :  { %65 = vmatpush.msra.mxu0 %v1473_v27  ;;  %1161 = vmatpush.msra.mxu2 %v1473_v27 }
  0x21   :  { %66 = vmatmul.f32.vlgmr.msra.gmra.mxu0 %v34_v28  ;;  %90 = vmatmul.f32.vlgmr.msra.gmra.mxu2 %v42_v29 }
  0x23   :  { %203 = vperm.xlu2 %1184, %v129_v31   ;;  %193 = vperm.xlu0 %1182, %v127_v32   ;;  %v415_v32 = vld [vmem:[%s2177_s2 + $0x30] sm:$0xff] }
  0x27   :  { %198 = vperm.xlu1 %1183, %v128_v35   ;;  %v417_v35 = vld [vmem:[%s2177_s2 + $0x40] sm:$0xff] }
  0x29   :  { %69 = vmatmul.f32.gmra.mxu0 %v35_v33  ;;  %93 = vmatmul.f32.gmra.mxu2 %v43_v34 }
  0x2b   :  { %208 = vperm.xlu0 %1182, %v130_v36  }
  0x31   :  { %72 = vmatmul.f32.gmra.mxu0 %v36_v37  ;;  %96 = vmatmul.f32.gmra.mxu2 %v44_v38  ;;  %v418_v37 = vld [vmem:[%s2177_s2 + $0x48] sm:$0xff] }
  0x39   :  { %75 = vmatmul.f32.gmra.mxu0 %v37_v39  ;;  %99 = vmatmul.f32.gmra.mxu2 %v45_v40  ;;  %v419_v40 = vld [vmem:[%s2177_s2 + $0x50] sm:$0xff] }
  0x41   :  { %78 = vmatmul.f32.gmra.mxu0 %v38_v41  ;;  %102 = vmatmul.f32.gmra.mxu2 %v46_v42  ;;  %v421_v42 = vld [vmem:[%s2177_s2 + $0x60] sm:$0xff] }
  0x49   :  { %81 = vmatmul.f32.gmra.mxu0 %v39_v43  ;;  %105 = vmatmul.f32.gmra.mxu2 %v47_v44 }
  0x4c   :  { %377 = vadd.xlane.f32.xlu2 %v361_v45  ;;  %v422_v45 = vld [vmem:[%s2177_s2 + $0x68] sm:$0xff] }
  0x51   :  { %84 = vmatmul.f32.gmra.mxu0 %v40_v46  ;;  %108 = vmatmul.f32.gmra.mxu2 %v48_v47  ;;  %v424_v47 = vld [vmem:[%s2177_s2 + $0x78] sm:$0xff] }
  0x54   :  { %381 = vadd.xlane.f32.xlu2 %v363_v48 }
  0x55   :  { %379 = vadd.xlane.f32.xlu0 %v362_v49 }
  0x59   :  { %87 = vmatmul.f32.gmra.mxu0 %v41_v50  ;;  %111 = vmatmul.f32.gmra.mxu2 %v49_v51 }
  0x5c   :  { %383 = vadd.xlane.f32.xlu2 %v364_v52 }
  0x5d   :  { %385 = vadd.xlane.f32.xlu0 %v365_v53  ;;  %v154_v38 = vpop.permute.xlu2 %153 }
  0x64   :  { %387 = vadd.xlane.f32.xlu2 %v366_v54 }
  0x65   :  { %389 = vadd.xlane.f32.xlu0 %v367_v55  ;;  %v159_v43 = vpop.permute.xlu2 %158 }
  0x6c   :  { %391 = vadd.xlane.f32.xlu2 %v368_v56 }
  0x6d   :  { %393 = vadd.xlane.f32.xlu0 %v369_v57  ;;  %v174_v56 = vpop.permute.xlu2 %173 }
  0x74   :  { %395 = vadd.xlane.f32.xlu2 %v370_v58 }
  0x75   :  { %397 = vadd.xlane.f32.xlu0 %v371_v59  ;;  %v134_v3 = vpop.permute.xlu0 %133 }
  0x79   :  { %v144_v28 = vpop.permute.xlu1 %143 }
  0x7c   :  { %399 = vadd.xlane.f32.xlu2 %v372_v60 }
  0x7d   :  { %401 = vadd.xlane.f32.xlu0 %v373_v61  ;;  %v139_v16 = vpop.permute.xlu0 %138 }
  0x81   :  { %v149_v33 = vpop.permute.xlu1 %148 }
  0x84   :  { %403 = vadd.xlane.f32.xlu2 %v374_v62 }
  0x85   :  { %405 = vadd.xlane.f32.xlu0 %v375_v63  ;;  %v164_v48 = vpop.permute.xlu0 %163 }
  0x89   :  { %v169_v52 = vpop.permute.xlu1 %168 }
  0x8c   :  { %407 = vadd.xlane.f32.xlu2 %v376_v1  ;;  %v189_v1 = vpop.permute.xlu2 %188 }
  0x8d   :  { %v179_v59 = vpop.permute.xlu0 %178 }
  0x91   :  { %v184_v62 = vpop.permute.xlu1 %183 }
  0x99   :  { %877 = vperm.xlu0 %1182, %v409_v2  }
  0x9e   :  { %v67_v8 = vpop.f32.mrf.mxu0 }
  0x9f   :  { %v211_v10 = vmul.f32 %v134_v3, %v67_v8  ;;  %v194_v8 = vpop.permute.xlu0 %193 }
  0xa1   :  { %886 = vperm.xlu0 %1182, %v412_v9   ;;  %227 = vxpose.xlu1.b32.start [1/16] %v211_v10, 128 }
  0xa4   :  { %880 = vperm.xlu2 %1184, %v410_v14   ;;  %v91_v49 = vpop.f32.mrf.mxu2  ;;  %v199_v14 = vpop.permute.xlu1 %198 }
  0xa5   :  { %v219_v57 = vmul.f32 %v174_v56, %v91_v49 }
  0xa6   :  { %v70_v17 = vpop.f32.mrf.mxu0 }
  0xa7   :  { %v212_v23 = vmul.f32 %v139_v16, %v70_v17 }
  0xa9   :  { %892 = vperm.xlu0 %1182, %v414_v21   ;;  %228 = vxpose.xlu1.b32.cont [2/16] %v212_v23, 128  ;;  %v204_v21 = vpop.permute.xlu2 %203 }
  0xac   :  { %889 = vperm.xlu2 %1184, %v413_v24   ;;  %v94_v55 = vpop.f32.mrf.mxu2 }
  0xad   :  { %v220_v60 = vmul.f32 %v179_v59, %v94_v55 }
  0xae   :  { %v73_v29 = vpop.f32.mrf.mxu0 }
  0xaf   :  { %v213_v31 = vmul.f32 %v144_v28, %v73_v29  ;;  %v209_v28 = vpop.permute.xlu0 %208 }
  0xb1   :  { %898 = vperm.xlu0 %1182, %v416_v30   ;;  %229 = vxpose.xlu1.b32.cont [3/16] %v213_v31, 128 }
  0xb4   :  { %895 = vperm.xlu2 %1184, %v415_v32   ;;  %v97_v58 = vpop.f32.mrf.mxu2 }
  0xb5   :  { %v221_v63 = vmul.f32 %v184_v62, %v97_v58 }
  0xb6   :  { %v76_v34 = vpop.f32.mrf.mxu0 }
  0xb7   :  { %v214_v36 = vmul.f32 %v149_v33, %v76_v34 }
  0xb9   :  { %901 = vperm.xlu0 %1182, %v417_v35   ;;  %230 = vxpose.xlu1.b32.cont [4/16] %v214_v36, 128  ;;  %v411_v36 = vld [vmem:[%s2177_s2 + $0x10] sm:$0xff] }
  0xbc   :  { %904 = vperm.xlu2 %1184, %v418_v37   ;;  %v100_v61 = vpop.f32.mrf.mxu2 }
  0xbd   :  { %v222_v3 = vmul.f32 %v189_v1, %v100_v61 }
  0xbe   :  { %v79_v39 = vpop.f32.mrf.mxu0 }
  0xbf   :  { %v215_v41 = vmul.f32 %v154_v38, %v79_v39  ;;  %v420_v38 = vld [vmem:[%s2177_s2 + $0x58] sm:$0xff] }
  0xc1   :  { %907 = vperm.xlu0 %1182, %v419_v40   ;;  %231 = vxpose.xlu1.b32.cont [5/16] %v215_v41, 128  ;;  %v423_v40 = vld [vmem:[%s2177_s2 + $0x70] sm:$0xff]  ;;  %s1308_s2 = smov [#allocation2]  }
  0xc2   :  { %s1135_s6 = sshll.u32 %s1308_s2, 4  ;;  %s1136_s6 = int_to_ptr.vmem [resolvable:$true] %s1135_s6 }
  0xc4   :  { %913 = vperm.xlu2 %1184, %v421_v42   ;;  %v103_v2 = vpop.f32.mrf.mxu2 }
  0xc5   :  { %v223_v9 = vmul.f32 %v194_v8, %v103_v2 }
  0xc6   :  { %v82_v44 = vpop.f32.mrf.mxu0 }
  0xc7   :  { %v216_v46 = vmul.f32 %v159_v43, %v82_v44 }
  0xc9   :  { %916 = vperm.xlu0 %1182, %v422_v45   ;;  %232 = vxpose.xlu1.b32.cont [6/16] %v216_v46, 128 }
  0xcc   :  { %922 = vperm.xlu2 %1184, %v424_v47   ;;  %v106_v10 = vpop.f32.mrf.mxu2 }
  0xcd   :  { %v224_v16 = vmul.f32 %v199_v14, %v106_v10 }
  0xce   :  { %v85_v50 = vpop.f32.mrf.mxu0 }
  0xcf   :  { %v217_v51 = vmul.f32 %v164_v48, %v85_v50 }
  0xd1   :  { %233 = vxpose.xlu1.b32.cont [7/16] %v217_v51, 128 }
  0xd4   :  { %v109_v17 = vpop.f32.mrf.mxu2 }
  0xd5   :  { %v225_v23 = vmul.f32 %v204_v21, %v109_v17 }
  0xd6   :  { %v88_v53 = vpop.f32.mrf.mxu0 }
  0xd7   :  { %v218_v54 = vmul.f32 %v169_v52, %v88_v53 }
  0xd9   :  { %234 = vxpose.xlu1.b32.cont [8/16] %v218_v54, 128 }
  0xdc   :  { %v112_v24 = vpop.f32.mrf.mxu2 }
  0xdd   :  { %v226_v29 = vmul.f32 %v209_v28, %v112_v24 }
  0xe1   :  { %235 = vxpose.xlu1.b32.cont [9/16] %v219_v57, 128 }
  0xe9   :  { %236 = vxpose.xlu1.b32.cont [10/16] %v220_v60, 128 }
  0xf1   :  { %237 = vxpose.xlu1.b32.cont [11/16] %v221_v63, 128 }
  0xf9   :  { %238 = vxpose.xlu1.b32.cont [12/16] %v222_v3, 128 }
 0x101   :  { %239 = vxpose.xlu1.b32.cont [13/16] %v223_v9, 128 }
 0x109   :  { %240 = vxpose.xlu1.b32.cont [14/16] %v224_v16, 128 }
 0x111   :  { %241 = vxpose.xlu1.b32.cont [15/16] %v225_v23, 128 }
 0x119   :  { %242 = vxpose.xlu1.b32.end [16/16] %v226_v29, 128 }
 0x145   :  { %v1613_v30 = vpop.trf.xlu1 }
 0x146   :  { %v259_v42 = vmul.f32 %v1613_v30, %v1613_v30 }
 0x14d   :  { %v1615_v31 = vpop.trf.xlu1 }
 0x14e   :  { %v260_v41 = vmul.f32 %v1615_v31, %v1615_v31 }
 0x150   :  { %v275_v45 = vadd.f32 %v260_v41, %v259_v42  ;;  %v1654_v42 = vpop.xlane.xlu0 %379 }
 0x155   :  { %v1617_v32 = vpop.trf.xlu1 }
 0x156   :  { %v261_v43 = vmul.f32 %v1617_v32, %v1617_v32 }
 0x158   :  { %v276_v47 = vadd.f32 %v275_v45, %v261_v43 }
 0x15d   :  { %v1619_v33 = vpop.trf.xlu1 }
 0x15e   :  { %v262_v46 = vmul.f32 %v1619_v33, %v1619_v33 }
 0x160   :  { %v277_v49 = vadd.f32 %v276_v47, %v262_v46 }
 0x165   :  { %v1621_v34 = vpop.trf.xlu1 }
 0x166   :  { %v263_v48 = vmul.f32 %v1621_v34, %v1621_v34 }
 0x168   :  { %v278_v51 = vadd.f32 %v277_v49, %v263_v48  ;;  %v386_v48 = vpop.xlane.xlu0 %385 }
 0x16d   :  { %v1623_v35 = vpop.trf.xlu1 }
 0x16e   :  { %v264_v50 = vmul.f32 %v1623_v35, %v1623_v35 }
 0x170   :  { %v279_v54 = vadd.f32 %v278_v51, %v264_v50 }
 0x173   :  { %883 = vperm.xlu1 %1183, %v411_v36  }
 0x175   :  { %v1628_v37 = vpop.trf.xlu1 }
 0x176   :  { %v265_v52 = vmul.f32 %v1628_v37, %v1628_v37 }
 0x178   :  { %v280_v56 = vadd.f32 %v279_v54, %v265_v52 }
 0x17b   :  { %910 = vperm.xlu1 %1183, %v420_v38  }
 0x17d   :  { %v1633_v39 = vpop.trf.xlu1 }
 0x17e   :  { %v266_v55 = vmul.f32 %v1633_v39, %v1633_v39 }
 0x180   :  { %v281_v58 = vadd.f32 %v280_v56, %v266_v55  ;;  %v697_v56 = vlaneseq }
 0x183   :  { %919 = vperm.xlu1 %1183, %v423_v40  }
 0x185   :  { %v251_v44 = vpop.trf.xlu1 }
 0x186   :  { %v267_v57 = vmul.f32 %v251_v44, %v251_v44 }
 0x188   :  { %v282_v60 = vadd.f32 %v281_v58, %v267_v57 }
 0x18d   :  { %v252_v53 = vpop.trf.xlu1 }
 0x18e   :  { %v268_v59 = vmul.f32 %v252_v53, %v252_v53 }
 0x190   :  { %v283_v62 = vadd.f32 %v282_v60, %v268_v59 }
 0x195   :  { %v253_v61 = vpop.trf.xlu1 }
 0x196   :  { %v269_v63 = vmul.f32 %v253_v61, %v253_v61 }
 0x198   :  { %v284_v1 = vadd.f32 %v283_v62, %v269_v63 }
 0x19d   :  { %v254_v2 = vpop.trf.xlu1 }
 0x19e   :  { %v270_v3 = vmul.f32 %v254_v2, %v254_v2 }
 0x1a0   :  { %v285_v8 = vadd.f32 %v284_v1, %v270_v3  ;;  %v1715_v3 = vand.u32 127, %v697_v56 }
 0x1a2   :  { %vm699_vm1 = vcmp.lt.s32.totalorder %v1715_v3, 4 }
 0x1a5   :  { %v255_v9 = vpop.trf.xlu1 }
 0x1a6   :  { %v271_v10 = vmul.f32 %v255_v9, %v255_v9 }
 0x1a8   :  { %v286_v14 = vadd.f32 %v285_v8, %v271_v10 }
 0x1ad   :  { %v256_v16 = vpop.trf.xlu1 }
 0x1ae   :  { %v272_v17 = vmul.f32 %v256_v16, %v256_v16 }
 0x1b0   :  { %v287_v21 = vadd.f32 %v286_v14, %v272_v17 }
 0x1b5   :  { %v257_v23 = vpop.trf.xlu1 }
 0x1b6   :  { %v273_v24 = vmul.f32 %v257_v23, %v257_v23 }
 0x1b8   :  { %v288_v28 = vadd.f32 %v287_v21, %v273_v24 }
 0x1bd   :  { %v258_v29 = vpop.trf.xlu1 }
 0x1be   :  { %v274_v36 = vmul.f32 %v258_v29, %v258_v29  ;;  %296 = vmatpush.msra.mxu1 %v258_v29  ;;  %1162 = vmatpush.msra.mxu3 %v258_v29 }
 0x1c0   :  { %v289_v38 = vadd.f32 %v288_v28, %v274_v36  ;;  %297 = vmatpush.msra.mxu1 %v257_v23  ;;  %1163 = vmatpush.msra.mxu3 %v257_v23 }
 0x1c2   :  { %v290_v40 = vrot.slane %v289_v38, 4  ;;  %298 = vmatpush.msra.mxu1 %v256_v16  ;;  %1164 = vmatpush.msra.mxu3 %v256_v16 }
 0x1c4   :  { %v291_v41 = vadd.f32 %v290_v40, %v289_v38  ;;  %299 = vmatpush.msra.mxu1 %v255_v9  ;;  %1165 = vmatpush.msra.mxu3 %v255_v9 }
 0x1c6   :  { %v292_v43 = vrot.slane %v291_v41, 2  ;;  %300 = vmatpush.msra.mxu1 %v254_v2  ;;  %1166 = vmatpush.msra.mxu3 %v254_v2 }
 0x1c8   :  { %v293_v45 = vadd.f32 %v292_v43, %v291_v41  ;;  %301 = vmatpush.msra.mxu1 %v253_v61  ;;  %1167 = vmatpush.msra.mxu3 %v253_v61 }
 0x1ca   :  { %v294_v46 = vrot.slane %v293_v45, 1  ;;  %302 = vmatpush.msra.mxu1 %v252_v53  ;;  %1168 = vmatpush.msra.mxu3 %v252_v53 }
 0x1cc   :  { %v1656_v47 = vadd.f32 %v294_v46, %v293_v45  ;;  %303 = vmatpush.msra.mxu1 %v251_v44  ;;  %1169 = vmatpush.msra.mxu3 %v251_v44 }
 0x1ce   :  { %304 = vmatpush.msra.mxu1 %v1633_v39  ;;  %1170 = vmatpush.msra.mxu3 %v1633_v39  ;;  %v1663_v49 = vadd.f32 %v386_v48, %v1656_v47 }
 0x1d0   :  { %305 = vmatpush.msra.mxu1 %v1628_v37  ;;  %1171 = vmatpush.msra.mxu3 %v1628_v37  ;;  %v426_v37 = vadd.f32 %v1654_v42, %v1656_v47 }
 0x1d2   :  { %306 = vmatpush.msra.mxu1 %v1623_v35  ;;  %1172 = vmatpush.msra.mxu3 %v1623_v35 }
 0x1d4   :  { %307 = vmatpush.msra.mxu1 %v1621_v34  ;;  %1173 = vmatpush.msra.mxu3 %v1621_v34 }
 0x1d6   :  { %308 = vmatpush.msra.mxu1 %v1619_v33  ;;  %1174 = vmatpush.msra.mxu3 %v1619_v33 }
 0x1d8   :  { %309 = vmatpush.msra.mxu1 %v1617_v32  ;;  %1175 = vmatpush.msra.mxu3 %v1617_v32 }
 0x1da   :  { %310 = vmatpush.msra.mxu1 %v1615_v31  ;;  %1176 = vmatpush.msra.mxu3 %v1615_v31 }
 0x1dc   :  { %311 = vmatpush.msra.mxu1 %v1613_v30  ;;  %1177 = vmatpush.msra.mxu3 %v1613_v30 }
 0x1dd   :  { %312 = vmatmul.f32.vlgmr.msra.gmra.mxu1 %v1473_v27  ;;  %336 = vmatmul.f32.vlgmr.msra.gmra.mxu3 %v1399_v13 }
 0x1e5   :  { %315 = vmatmul.f32.gmra.mxu1 %v1466_v26  ;;  %339 = vmatmul.f32.gmra.mxu3 %v1392_v12 }
 0x1ed   :  { %318 = vmatmul.f32.gmra.mxu1 %v1459_v25  ;;  %342 = vmatmul.f32.gmra.mxu3 %v1385_v11  ;;  %v378_v11 = vpop.xlane.xlu2 %377 }
 0x1f5   :  { %321 = vmatmul.f32.gmra.mxu1 %v1446_v22  ;;  %345 = vmatmul.f32.gmra.mxu3 %v1369_v7  ;;  %v382_v12 = vpop.xlane.xlu2 %381  ;;  %v1693_v7 = vpop.xlane.xlu0 %389 }
 0x1f6   :  { %v427_v62 = vadd.f32 %v382_v12, %v1656_v47  ;;  %v1745_v48 = vadd.f32 %v1693_v7, %v1656_v47 }
 0x1fd   :  { %324 = vmatmul.f32.gmra.mxu1 %v1436_v20  ;;  %348 = vmatmul.f32.gmra.mxu3 %v1362_v6  ;;  %v384_v13 = vpop.xlane.xlu2 %383  ;;  %v394_v22 = vpop.xlane.xlu0 %393 }
 0x1fe   :  { %v433_v31 = vadd.f32 %v394_v22, %v1656_v47  ;;  %v428_v16 = vadd.f32 %v384_v13, %v1656_v47 }
 0x205   :  { %327 = vmatmul.f32.gmra.mxu1 %v1429_v19  ;;  %351 = vmatmul.f32.gmra.mxu3 %v1355_v5  ;;  %v388_v20 = vpop.xlane.xlu2 %387  ;;  %v398_v19 = vpop.xlane.xlu0 %397 }
 0x206   :  { %v435_v14 = vadd.f32 %v398_v19, %v1656_v47  ;;  %v1732_v36 = vadd.f32 %v388_v20, %v1656_v47 }
 0x20d   :  { %330 = vmatmul.f32.gmra.mxu1 %v1422_v18  ;;  %354 = vmatmul.f32.gmra.mxu3 %v1348_v4  ;;  %v1695_v6 = vpop.xlane.xlu2 %391  ;;  %v402_v5 = vpop.xlane.xlu0 %401  ;;  %v425_v18 = vadd.f32 %v378_v11, %v1656_v47 }
 0x20e   :  { %v1729_v29 = vadd.f32 %v402_v5, %v1656_v47 }
 0x215   :  { %333 = vmatmul.f32.gmra.mxu1 %v1409_v15  ;;  %357 = vmatmul.f32.gmra.mxu3 %v1337_v0  ;;  %v396_v25 = vpop.xlane.xlu2 %395  ;;  %v1702_v34 = vpop.xlane.xlu0 %405 }
 0x216   :  { %v434_v57 = vadd.f32 %v396_v25, %v1656_v47 }
 0x21d   :  { %v400_v27 = vpop.xlane.xlu2 %399  ;;  %v878_v8 = vpop.permute.xlu0 %877 }
 0x21e   :  { %v1722_v17 = vadd.f32 %v400_v27, %v1656_v47  ;;  %vm924_vm0 = vcmp.eq.s32.totalorder %v1715_v3, %v878_v8 }
 0x225   :  { %v404_v51 = vpop.xlane.xlu2 %403 }
 0x226   :  { %v1739_v45 = vadd.f32 %v404_v51, %v1656_v47 }
 0x22d   :  { %v1734_v38 = vpop.xlane.xlu2 %407 }
 0x25a   :  { %v313_v26 = vpop.f32.mrf.mxu1 }
 0x25b   :  { %v441_v4 = vmul.f32 2.0, %v313_v26 }
 0x25d   :  { %v457_v15 = vsub.f32 %v425_v18, %v441_v4 }
 0x25f   :  { %v1698_v30 = vmax.f32 %v457_v15, 0.0 }
 0x260   :  { %v337_v0 = vpop.f32.mrf.mxu3 }
 0x261   :  { %1185 = vrsqrt.f32 %v1698_v30  ;;  %v449_v32 = vmul.f32 2.0, %v337_v0  ;;  %vm496_vm2 = vcmp.eq.f32.partialorder %v1698_v30, inf  ;;  %vm498_vm3 = vcmp.eq.f32.partialorder %v1698_v30, 0.0 }
 0x262   :  { %v316_v33 = vpop.f32.mrf.mxu1  ;;  %v499_v25 = vand.u32 2147483648, %v1698_v30 }
 0x263   :  { %v465_v35 = vsub.f32 %v433_v31, %v449_v32  ;;  %v442_v39 = vmul.f32 2.0, %v316_v33 }
 0x265   :  { %v1706_v44 = vmax.f32 %v465_v35, 0.0  ;;  %v458_v50 = vsub.f32 %v426_v37, %v442_v39 }
 0x267   :  { %v1186_v52 = vpop.eup %1185  ;;  %1187 = vrsqrt.f32 %v1706_v44  ;;  %v1709_v53 = vmax.f32 %v458_v50, 0.0  ;;  %vm592_vm4 = vcmp.eq.f32.partialorder %v1706_v44, inf  ;;  %vm594_vm5 = vcmp.eq.f32.partialorder %v1706_v44, 0.0 }
 0x268   :  { %v340_v54 = vpop.f32.mrf.mxu3  ;;  %v490_v55 = vmul.f32 %v1186_v52, %v1698_v30  ;;  %v595_v37 = vand.u32 2147483648, %v1706_v44 }
 0x269   :  { %1189 = vrsqrt.f32 %v1709_v53  ;;  %v450_v58 = vmul.f32 2.0, %v340_v54  ;;  %vm508_vm6 = vcmp.eq.f32.partialorder %v1709_v53, inf  ;;  %vm510_vm7 = vcmp.eq.f32.partialorder %v1709_v53, 0.0 }
 0x26a   :  { %v319_v59 = vpop.f32.mrf.mxu1  ;;  %v491_v60 = vmul.f32 %v1186_v52, %v490_v55 }
 0x26b   :  { %v466_v61 = vsub.f32 %v434_v57, %v450_v58  ;;  %v443_v63 = vmul.f32 2.0, %v319_v59  ;;  %v881_v58 = vpop.permute.xlu2 %880 }
 0x26c   :  { %v492_v1 = vmul.f32 0.5, %v491_v60  ;;  %vm925_vm8 = vcmp.eq.s32.totalorder %v1715_v3, %v881_v58 }
 0x26d   :  { %v1188_v2 = vpop.eup %1187  ;;  %v1717_v9 = vmax.f32 %v466_v61, 0.0  ;;  %v459_v10 = vsub.f32 %v427_v62, %v443_v63  ;;  %v511_v62 = vand.u32 2147483648, %v1709_v53 }
 0x26e   :  { %v493_v21 = vsub.f32 1.5, %v492_v1  ;;  %v586_v23 = vmul.f32 %v1188_v2, %v1706_v44 }
 0x26f   :  { %v1190_v24 = vpop.eup %1189  ;;  %1191 = vrsqrt.f32 %v1717_v9  ;;  %v1726_v28 = vmax.f32 %v459_v10, 0.0  ;;  %vm604_vm9 = vcmp.eq.f32.partialorder %v1717_v9, inf  ;;  %vm606_vm10 = vcmp.eq.f32.partialorder %v1717_v9, 0.0 }
 0x270   :  { %v343_v40 = vpop.f32.mrf.mxu3  ;;  %v494_v41 = vmul.f32 %v1186_v52, %v493_v21  ;;  %v587_v42 = vmul.f32 %v1188_v2, %v586_v23  ;;  %v502_v43 = vmul.f32 %v1190_v24, %v1709_v53 }
 0x271   :  { %1193 = vrsqrt.f32 %v1726_v28  ;;  %v451_v46 = vmul.f32 2.0, %v343_v40  ;;  %vm520_vm12 = vcmp.eq.f32.partialorder %v1726_v28, inf  ;;  %vm522_vm13 = vcmp.eq.f32.partialorder %v1726_v28, 0.0 }
 0x272   :  { %v322_v11 = vpop.f32.mrf.mxu1  ;;  %v495_v12 = vmul.f32 %v494_v41, %v1698_v30  ;;  %v588_v13 = vmul.f32 0.5, %v587_v42  ;;  %v503_v20 = vmul.f32 %v1190_v24, %v502_v43 }
 0x273   :  { %v467_v22 = vsub.f32 %v435_v14, %v451_v46  ;;  %v444_v19 = vmul.f32 2.0, %v322_v11 }
 0x274   :  { %v497_v5 = vsel %vm496_vm2, %v1698_v30, %v495_v12  ;;  %v589_v26 = vsub.f32 1.5, %v588_v13  ;;  %v504_v7 = vmul.f32 0.5, %v503_v20 }
 0x275   :  { %v1192_v18 = vpop.eup %1191  ;;  %v1753_v4 = vmax.f32 %v467_v22, 0.0  ;;  %v460_v27 = vsub.f32 %v428_v16, %v444_v19  ;;  %v500_v15 = vsel %vm498_vm3, %v499_v25, %v497_v5  ;;  %v607_v5 = vand.u32 2147483648, %v1717_v9 }
 0x276   :  { %v681_v0 = vsub.f32 0.0, %v500_v15  ;;  %v590_v31 = vmul.f32 %v1188_v2, %v589_v26  ;;  %v505_v32 = vsub.f32 1.5, %v504_v7  ;;  %v598_v33 = vmul.f32 %v1192_v18, %v1717_v9 }
 0x277   :  { %v1194_v35 = vpop.eup %1193  ;;  %1195 = vrsqrt.f32 %v1753_v4  ;;  %v1758_v30 = vmax.f32 %v460_v27, 0.0  ;;  %vm618_vm2 = vcmp.eq.f32.partialorder %v1753_v4, 0.0 }
 0x278   :  { %v346_v39 = vpop.f32.mrf.mxu3  ;;  %v1764_v50 = vsel %vm699_vm1, %v681_v0, -1e+30  ;;  %v591_v51 = vmul.f32 %v590_v31, %v1706_v44  ;;  %v506_v52 = vmul.f32 %v1190_v24, %v505_v32  ;;  %v599_v54 = vmul.f32 %v1192_v18, %v598_v33 }
 0x279   :  { %1197 = vrsqrt.f32 %v1758_v30  ;;  %v452_v55 = vmul.f32 2.0, %v346_v39  ;;  %716 = vmax.xlane.f32.xlu0 %v1764_v50  ;;  %v940_v56 = vsel %vm924_vm0, %v1764_v50, 0.0  ;;  %v514_v57 = vmul.f32 %v1194_v35, %v1726_v28 }
 0x27a   :  { %v325_v59 = vpop.f32.mrf.mxu1  ;;  %956 = vadd.xlane.f32.xlu2 %v940_v56  ;;  %v593_v60 = vsel %vm592_vm4, %v1706_v44, %v591_v51  ;;  %v507_v61 = vmul.f32 %v506_v52, %v1709_v53  ;;  %v600_v63 = vmul.f32 0.5, %v599_v54  ;;  %v884_v44 = vpop.permute.xlu1 %883  ;;  %vm532_vm14 = vcmp.eq.f32.partialorder %v1758_v30, inf }
 0x27b   :  { %v468_v1 = vsub.f32 %v1722_v17, %v452_v55  ;;  %v445_v2 = vmul.f32 2.0, %v325_v59  ;;  %v596_v8 = vsel %vm594_vm5, %v595_v37, %v593_v60  ;;  %v515_v10 = vmul.f32 %v1194_v35, %v514_v57 }
 0x27c   :  { %v689_v14 = vsub.f32 0.0, %v596_v8  ;;  %v509_v16 = vsel %vm508_vm6, %v1709_v53, %v507_v61  ;;  %v601_v21 = vsub.f32 1.5, %v600_v63  ;;  %vm926_vm11 = vcmp.eq.s32.totalorder %v1715_v3, %v884_v44 }
 0x27d   :  { %v1196_v23 = vpop.eup %1195  ;;  %v1786_v24 = vmax.f32 %v468_v1, 0.0  ;;  %v461_v17 = vsub.f32 %v1663_v49, %v445_v2  ;;  %v512_v40 = vsel %vm510_vm7, %v511_v62, %v509_v16  ;;  %v516_v41 = vmul.f32 0.5, %v515_v10 }
 0x27e   :  { %v682_v42 = vsub.f32 0.0, %v512_v40  ;;  %v602_v43 = vmul.f32 %v1192_v18, %v601_v21  ;;  %v610_v12 = vmul.f32 %v1196_v23, %v1753_v4  ;;  %v1797_v49 = vsel %vm699_vm1, %v689_v14, -1e+30 }
 0x27f   :  { %v1198_v46 = vpop.eup %1197  ;;  %1199 = vrsqrt.f32 %v1786_v24  ;;  %v1792_v53 = vmax.f32 %v461_v17, 0.0  ;;  %v517_v11 = vsub.f32 1.5, %v516_v41  ;;  %v523_v37 = vand.u32 2147483648, %v1726_v28  ;;  %v1851_v41 = vpop.permute.xlu0 %886 }
 0x280   :  { %v349_v13 = vpop.f32.mrf.mxu3  ;;  %v1801_v20 = vsel %vm699_vm1, %v682_v42, -1e+30  ;;  %v603_v22 = vmul.f32 %v602_v43, %v1717_v9  ;;  %v526_v19 = vmul.f32 %v1198_v46, %v1758_v30  ;;  %v611_v15 = vmul.f32 %v1196_v23, %v610_v12 }
 0x281   :  { %1201 = vrsqrt.f32 %v1792_v53  ;;  %v453_v25 = vmul.f32 2.0, %v349_v13  ;;  %732 = vmax.xlane.f32.xlu0 %v1797_v49  ;;  %v518_v26 = vmul.f32 %v1194_v35, %v517_v11  ;;  %v535_v17 = vand.u32 2147483648, %v1758_v30 }
 0x282   :  { %v328_v7 = vpop.f32.mrf.mxu1  ;;  %718 = vmax.xlane.f32.xlu2 %v1801_v20  ;;  %v605_v18 = vsel %vm604_vm9, %v1717_v9, %v603_v22  ;;  %v527_v27 = vmul.f32 %v1198_v46, %v526_v19  ;;  %v612_v51 = vmul.f32 0.5, %v611_v15  ;;  %v941_v9 = vsel %vm925_vm8, %v1801_v20, 0.0 }
 0x283   :  { %v469_v0 = vsub.f32 %v1729_v29, %v453_v25  ;;  %v446_v31 = vmul.f32 2.0, %v328_v7  ;;  %v608_v32 = vsel %vm606_vm10, %v607_v5, %v605_v18  ;;  %v519_v33 = vmul.f32 %v518_v26, %v1726_v28 }
 0x284   :  { %v690_v35 = vsub.f32 0.0, %v608_v32  ;;  %v528_v39 = vmul.f32 0.5, %v527_v27  ;;  %v613_v57 = vsub.f32 1.5, %v612_v51  ;;  %vm534_vm15 = vcmp.eq.f32.partialorder %v1758_v30, 0.0 }
 0x285   :  { %v1200_v52 = vpop.eup %1199  ;;  %v462_v54 = vsub.f32 %v1732_v36, %v446_v31  ;;  %v521_v55 = vsel %vm520_vm12, %v1726_v28, %v519_v33  ;;  %v1828_v60 = vmax.f32 %v469_v0, 0.0  ;;  %vm616_vm0 = vcmp.eq.f32.partialorder %v1753_v4, inf }
 0x286   :  { %v524_v29 = vsel %vm522_vm13, %v523_v37, %v521_v55  ;;  %v529_v56 = vsub.f32 1.5, %v528_v39  ;;  %v622_v62 = vmul.f32 %v1200_v52, %v1786_v24  ;;  %v1835_v28 = vsel %vm699_vm1, %v690_v35, -1e+30 }
 0x287   :  { %v1826_v59 = vpop.eup %1201  ;;  %v1830_v61 = vmax.f32 %v462_v54, 0.0  ;;  %v683_v36 = vsub.f32 0.0, %v524_v29  ;;  %v614_v58 = vmul.f32 %v1196_v23, %v613_v57  ;;  %v619_v25 = vand.u32 2147483648, %v1753_v4 }
 0x288   :  { %v352_v63 = vpop.f32.mrf.mxu3  ;;  %v530_v1 = vmul.f32 %v1198_v46, %v529_v56  ;;  %v538_v2 = vmul.f32 %v1826_v59, %v1792_v53  ;;  %v623_v14 = vmul.f32 %v1200_v52, %v622_v62  ;;  %v439_v18 = vadd.f32 %v1702_v34, %v1656_v47 }
 0x289   :  { %1203 = vrsqrt.f32 %v1830_v61  ;;  %v454_v8 = vmul.f32 2.0, %v352_v63  ;;  %958 = vadd.xlane.f32.xlu0 %v941_v9  ;;  %v1842_v10 = vsel %vm699_vm1, %v683_v36, -1e+30  ;;  %v615_v40 = vmul.f32 %v614_v58, %v1753_v4  ;;  %v893_v36 = vpop.permute.xlu0 %892 }
 0x28a   :  { %v331_v16 = vpop.f32.mrf.mxu1  ;;  %734 = vmax.xlane.f32.xlu2 %v1835_v28  ;;  %v942_v21 = vsel %vm926_vm11, %v1842_v10, 0.0  ;;  %v531_v23 = vmul.f32 %v530_v1, %v1758_v30  ;;  %1205 = vrsqrt.f32 %v1828_v60  ;;  %v624_v46 = vmul.f32 0.5, %v623_v14 }
 0x28b   :  { %v470_v42 = vsub.f32 %v1739_v45, %v454_v8  ;;  %v447_v43 = vmul.f32 2.0, %v331_v16  ;;  %960 = vadd.xlane.f32.xlu1 %v942_v21  ;;  %v539_v11 = vmul.f32 %v1826_v59, %v538_v2  ;;  %v617_v45 = vsel %vm616_vm0, %v1753_v4, %v615_v40 }
 0x28c   :  { %v533_v44 = vsel %vm532_vm14, %v1758_v30, %v531_v23  ;;  %v625_v5 = vsub.f32 1.5, %v624_v46  ;;  %v620_v15 = vsel %vm618_vm2, %v619_v25, %v617_v45  ;;  %v432_v35 = vadd.f32 %v1695_v6, %v1656_v47 }
 0x28d   :  { %v1861_v12 = vmax.f32 %v470_v42, 0.0  ;;  %v463_v13 = vsub.f32 %v1745_v48, %v447_v43  ;;  %v536_v22 = vsel %vm534_vm15, %v535_v17, %v533_v44  ;;  %v540_v26 = vmul.f32 0.5, %v539_v11 }
 0x28e   :  { %v684_v19 = vsub.f32 0.0, %v536_v22  ;;  %v626_v0 = vmul.f32 %v1200_v52, %v625_v5  ;;  %vm628_vm3 = vcmp.eq.f32.partialorder %v1786_v24, inf  ;;  %vm630_vm4 = vcmp.eq.f32.partialorder %v1786_v24, 0.0 }
 0x28f   :  { %v1204_v7 = vpop.eup %1203  ;;  %1207 = vrsqrt.f32 %v1861_v12  ;;  %v1867_v30 = vmax.f32 %v463_v13, 0.0  ;;  %v541_v34 = vsub.f32 1.5, %v540_v26  ;;  %v631_v39 = vand.u32 2147483648, %v1786_v24 }
 0x290   :  { %v355_v27 = vpop.f32.mrf.mxu3  ;;  %v1874_v48 = vsel %vm699_vm1, %v684_v19, -1e+30  ;;  %v550_v31 = vmul.f32 %v1204_v7, %v1830_v61  ;;  %v1206_v32 = vpop.eup %1205  ;;  %v627_v37 = vmul.f32 %v626_v0, %v1786_v24  ;;  %v691_v55 = vsub.f32 0.0, %v620_v15 }
 0x291   :  { %v455_v33 = vmul.f32 2.0, %v355_v27  ;;  %720 = vmax.xlane.f32.xlu0 %v1842_v10  ;;  %1209 = vrsqrt.f32 %v1867_v30  ;;  %v542_v29 = vmul.f32 %v1826_v59, %v541_v34  ;;  %v634_v56 = vmul.f32 %v1206_v32, %v1828_v60 }
 0x292   :  { %v334_v4 = vpop.f32.mrf.mxu1  ;;  %722 = vmax.xlane.f32.xlu2 %v1874_v48  ;;  %v551_v51 = vmul.f32 %v1204_v7, %v550_v31  ;;  %v629_v6 = vsel %vm628_vm3, %v1786_v24, %v627_v37  ;;  %vm927_vm5 = vcmp.eq.s32.totalorder %v1715_v3, %v1851_v41  ;;  %v440_v59 = vadd.f32 %v1734_v38, %v1656_v47 }
 0x293   :  { %v471_v52 = vsub.f32 %v439_v18, %v455_v33  ;;  %v448_v54 = vmul.f32 2.0, %v334_v4  ;;  %v632_v1 = vsel %vm630_vm4, %v631_v39, %v629_v6  ;;  %v635_v14 = vmul.f32 %v1206_v32, %v634_v56 }
 0x294   :  { %v552_v9 = vmul.f32 0.5, %v551_v51  ;;  %v692_v58 = vsub.f32 0.0, %v632_v1  ;;  %v1902_v21 = vsel %vm699_vm1, %v691_v55, -1e+30  ;;  %vm544_vm6 = vcmp.eq.f32.partialorder %v1792_v53, inf }
 0x295   :  { %v1208_v57 = vpop.eup %1207  ;;  %v1891_v62 = vmax.f32 %v471_v52, 0.0  ;;  %v464_v63 = vsub.f32 %v432_v35, %v448_v54  ;;  %vm929_vm7 = vcmp.eq.s32.totalorder %v1715_v3, %v893_v36  ;;  %v543_v17 = vmul.f32 %v542_v29, %v1792_v53 }
 0x296   :  { %v553_v2 = vsub.f32 1.5, %v552_v9  ;;  %v646_v8 = vmul.f32 %v1208_v57, %v1861_v12  ;;  %v1912_v47 = vsel %vm699_vm1, %v692_v58, -1e+30  ;;  %v636_v38 = vmul.f32 0.5, %v635_v14 }
 0x297   :  { %v1896_v16 = vmax.f32 %v464_v63, 0.0  ;;  %1211 = vrsqrt.f32 %v1891_v62  ;;  %v1210_v42 = vpop.eup %1209  ;;  %vm556_vm8 = vcmp.eq.f32.partialorder %v1830_v61, inf  ;;  %vm558_vm9 = vcmp.eq.f32.partialorder %v1830_v61, 0.0 }
 0x298   :  { %v358_v24 = vpop.f32.mrf.mxu3  ;;  %v554_v23 = vmul.f32 %v1204_v7, %v553_v2  ;;  %v647_v40 = vmul.f32 %v1208_v57, %v646_v8  ;;  %v559_v13 = vand.u32 2147483648, %v1830_v61  ;;  %vm546_vm10 = vcmp.eq.f32.partialorder %v1792_v53, 0.0 }
 0x299   :  { %1213 = vrsqrt.f32 %v1896_v16  ;;  %v456_v43 = vmul.f32 2.0, %v358_v24  ;;  %736 = vmax.xlane.f32.xlu0 %v1902_v21  ;;  %v637_v22 = vsub.f32 1.5, %v636_v38  ;;  %v545_v19 = vsel %vm544_vm6, %v1792_v53, %v543_v17 }
 0x29a   :  { %738 = vmax.xlane.f32.xlu2 %v1912_v47  ;;  %v555_v46 = vmul.f32 %v554_v23, %v1830_v61  ;;  %v648_v44 = vmul.f32 0.5, %v647_v40  ;;  %v562_v5 = vmul.f32 %v1210_v42, %v1867_v30  ;;  %v547_v18 = vand.u32 2147483648, %v1792_v53 }
 0x29b   :  { %v472_v11 = vsub.f32 %v440_v59, %v456_v43  ;;  %v638_v27 = vmul.f32 %v1206_v32, %v637_v22  ;;  %v943_v0 = vsel %vm927_vm5, %v1874_v48, 0.0  ;;  %vm652_vm11 = vcmp.eq.f32.partialorder %v1861_v12, inf }
 0x29c   :  { %v557_v45 = vsel %vm556_vm8, %v1830_v61, %v555_v46  ;;  %v649_v25 = vsub.f32 1.5, %v648_v44  ;;  %v563_v33 = vmul.f32 %v1210_v42, %v562_v5  ;;  %v548_v34 = vsel %vm546_vm10, %v547_v18, %v545_v19 }
 0x29d   :  { %v1925_v26 = vmax.f32 %v472_v11, 0.0  ;;  %v560_v7 = vsel %vm558_vm9, %v559_v13, %v557_v45  ;;  %v1212_v15 = vpop.eup %1211  ;;  %vm654_vm12 = vcmp.eq.f32.partialorder %v1861_v12, 0.0  ;;  %v655_v53 = vand.u32 2147483648, %v1861_v12 }
 0x29e   :  { %v686_v61 = vsub.f32 0.0, %v560_v7  ;;  %v650_v31 = vmul.f32 %v1208_v57, %v649_v25  ;;  %v564_v37 = vmul.f32 0.5, %v563_v33  ;;  %v639_v51 = vmul.f32 %v638_v27, %v1828_v60 }
 0x29f   :  { %v1214_v35 = vpop.eup %1213  ;;  %1215 = vrsqrt.f32 %v1925_v26  ;;  %v658_v52 = vmul.f32 %v1212_v15, %v1891_v62  ;;  %v685_v54 = vsub.f32 0.0, %v548_v34  ;;  %vm640_vm13 = vcmp.eq.f32.partialorder %v1828_v60, inf }
 0x2a0   :  { %v1939_v32 = vsel %vm699_vm1, %v686_v61, -1e+30  ;;  %v651_v41 = vmul.f32 %v650_v31, %v1861_v12  ;;  %v574_v4 = vmul.f32 %v1214_v35, %v1896_v16  ;;  %v565_v9 = vsub.f32 1.5, %v564_v37 }
 0x2a1   :  { %962 = vadd.xlane.f32.xlu0 %v943_v0  ;;  %v945_v39 = vsel %vm929_vm7, %v1939_v32, 0.0  ;;  %v659_v56 = vmul.f32 %v1212_v15, %v658_v52  ;;  %vm642_vm14 = vcmp.eq.f32.partialorder %v1828_v60, 0.0  ;;  %v641_v58 = vsel %vm640_vm13, %v1828_v60, %v639_v51 }
 0x2a2   :  { %726 = vmax.xlane.f32.xlu2 %v1939_v32  ;;  %966 = vadd.xlane.f32.xlu1 %v945_v39  ;;  %v653_v55 = vsel %vm652_vm11, %v1861_v12, %v651_v41  ;;  %v575_v6 = vmul.f32 %v1214_v35, %v574_v4  ;;  %v566_v36 = vmul.f32 %v1210_v42, %v565_v9  ;;  %v643_v2 = vand.u32 2147483648, %v1828_v60 }
 0x2a3   :  { %v656_v29 = vsel %vm654_vm12, %v655_v53, %v653_v55  ;;  %v660_v8 = vmul.f32 0.5, %v659_v56  ;;  %v1959_v14 = vsel %vm699_vm1, %v685_v54, -1e+30  ;;  %vm568_vm15 = vcmp.eq.f32.partialorder %v1867_v30, inf  ;;  %v890_v53 = vpop.permute.xlu2 %889 }
 0x2a4   :  { %v576_v57 = vmul.f32 0.5, %v575_v6  ;;  %v694_v1 = vsub.f32 0.0, %v656_v29  ;;  %v567_v59 = vmul.f32 %v566_v36, %v1867_v30  ;;  %vm570_vm0 = vcmp.eq.f32.partialorder %v1867_v30, 0.0 }
 0x2a5   :  { %v1216_v63 = vpop.eup %1215  ;;  %v571_v23 = vand.u32 2147483648, %v1867_v30  ;;  %v661_v17 = vsub.f32 1.5, %v660_v8  ;;  %v644_v40 = vsel %vm642_vm14, %v643_v2, %v641_v58  ;;  %vm580_vm2 = vcmp.eq.f32.partialorder %v1896_v16, inf }
 0x2a6   :  { %v577_v12 = vsub.f32 1.5, %v576_v57  ;;  %v670_v24 = vmul.f32 %v1216_v63, %v1925_v26  ;;  %v569_v43 = vsel %vm568_vm15, %v1867_v30, %v567_v59  ;;  %v1972_v46 = vsel %vm699_vm1, %v694_v1, -1e+30 }
 0x2a7   :  { %v572_v44 = vsel %vm570_vm0, %v571_v23, %v569_v43  ;;  %v662_v11 = vmul.f32 %v1212_v15, %v661_v17  ;;  %vm582_vm3 = vcmp.eq.f32.partialorder %v1896_v16, 0.0  ;;  %v693_v30 = vsub.f32 0.0, %v644_v40 }
 0x2a8   :  { %v578_v42 = vmul.f32 %v1214_v35, %v577_v12  ;;  %v671_v38 = vmul.f32 %v1216_v63, %v670_v24  ;;  %v687_v60 = vsub.f32 0.0, %v572_v44  ;;  %v583_v45 = vand.u32 2147483648, %v1896_v16 }
 0x2a9   :  { %724 = vmax.xlane.f32.xlu0 %v1959_v14  ;;  %v663_v19 = vmul.f32 %v662_v11, %v1891_v62  ;;  %vm664_vm4 = vcmp.eq.f32.partialorder %v1891_v62, inf  ;;  %v667_v7 = vand.u32 2147483648, %v1891_v62  ;;  %vm666_vm5 = vcmp.eq.f32.partialorder %v1891_v62, 0.0 }
 0x2aa   :  { %742 = vmax.xlane.f32.xlu2 %v1972_v46  ;;  %v579_v13 = vmul.f32 %v578_v42, %v1896_v16  ;;  %v672_v22 = vmul.f32 0.5, %v671_v38  ;;  %v1984_v5 = vsel %vm699_vm1, %v687_v60, -1e+30  ;;  %v1991_v35 = vsel %vm699_vm1, %v693_v30, -1e+30 }
 0x2ab   :  { %v665_v15 = vsel %vm664_vm4, %v1891_v62, %v663_v19  ;;  %vm676_vm6 = vcmp.eq.f32.partialorder %v1925_v26, inf  ;;  %v679_v62 = vand.u32 2147483648, %v1925_v26  ;;  %vm678_vm7 = vcmp.eq.f32.partialorder %v1925_v26, 0.0  ;;  %v896_v54 = vpop.permute.xlu2 %895 }
 0x2ac   :  { %v581_v25 = vsel %vm580_vm2, %v1896_v16, %v579_v13  ;;  %v673_v18 = vsub.f32 1.5, %v672_v22  ;;  %v668_v61 = vsel %vm666_vm5, %v667_v7, %v665_v15  ;;  %vm928_vm8 = vcmp.eq.s32.totalorder %v1715_v3, %v890_v53 }
 0x2ad   :  { %v584_v27 = vsel %vm582_vm3, %v583_v45, %v581_v25  ;;  %v695_v33 = vsub.f32 0.0, %v668_v61  ;;  %v944_v52 = vsel %vm928_vm8, %v1959_v14, 0.0  ;;  %vm930_vm9 = vcmp.eq.s32.totalorder %v1715_v3, %v896_v54 }
 0x2ae   :  { %v688_v0 = vsub.f32 0.0, %v584_v27  ;;  %v674_v31 = vmul.f32 %v1216_v63, %v673_v18  ;;  %v946_v55 = vsel %vm930_vm9, %v1984_v5, 0.0  ;;  %vm1085_vm3 = vcmask 7168  }
 0x2af   :  { %v2001_v41 = vsel %vm699_vm1, %v695_v33, -1e+30  ;;  %vm1128_vm4 = vcmask 0  }
 0x2b0   :  { %v1995_v16 = vsel %vm699_vm1, %v688_v0, -1e+30  ;;  %v675_v34 = vmul.f32 %v674_v31, %v1925_v26 }
 0x2b1   :  { %740 = vmax.xlane.f32.xlu0 %v1991_v35 }
 0x2b2   :  { %730 = vmax.xlane.f32.xlu2 %v1995_v16  ;;  %v677_v4 = vsel %vm676_vm6, %v1925_v26, %v675_v34  ;;  %v2017_v26 = vpop.permute.xlu0 %898 }
 0x2b3   :  { %v680_v37 = vsel %vm678_vm7, %v679_v62, %v677_v4  ;;  %v2023_v9 = vpop.permute.xlu2 %904 }
 0x2b4   :  { %v696_v39 = vsub.f32 0.0, %v680_v37  ;;  %vm933_vm11 = vcmp.eq.s32.totalorder %v1715_v3, %v2023_v9 }
 0x2b6   :  { %v2010_v51 = vsel %vm699_vm1, %v696_v39, -1e+30  ;;  %vm931_vm1 = vcmp.eq.s32.totalorder %v1715_v3, %v2017_v26 }
 0x2b9   :  { %728 = vmax.xlane.f32.xlu0 %v1984_v5 }
 0x2ba   :  { %964 = vadd.xlane.f32.xlu2 %v944_v52  ;;  %v2021_v6 = vpop.permute.xlu0 %901 }
 0x2bb   :  { %v2027_v56 = vpop.permute.xlu2 %913  ;;  %vm932_vm10 = vcmp.eq.s32.totalorder %v1715_v3, %v2021_v6  ;;  %v911_v6 = vpop.permute.xlu1 %910 }
 0x2bc   :  { %vm935_vm14 = vcmp.eq.s32.totalorder %v1715_v3, %v911_v6  ;;  %vm936_vm15 = vcmp.eq.s32.totalorder %v1715_v3, %v2027_v56 }
 0x2bd   :  { %v951_v9 = vsel %vm935_vm14, %v1912_v47, 0.0 }
 0x2c1   :  { %744 = vmax.xlane.f32.xlu0 %v2001_v41 }
 0x2c2   :  { %746 = vmax.xlane.f32.xlu2 %v2010_v51  ;;  %v2025_v29 = vpop.permute.xlu0 %907 }
 0x2c3   :  { %v2031_v36 = vpop.permute.xlu2 %922  ;;  %vm934_vm12 = vcmp.eq.s32.totalorder %v1715_v3, %v2025_v29 }
 0x2c4   :  { %vm939_vm2 = vcmp.eq.s32.totalorder %v1715_v3, %v2031_v36 }
 0x2c9   :  { %968 = vadd.xlane.f32.xlu0 %v946_v55 }
 0x2ca   :  { %v2029_v57 = vpop.permute.xlu0 %916 }
 0x2cb   :  { %vm937_vm13 = vcmp.eq.s32.totalorder %v1715_v3, %v2029_v57  ;;  %v955_v57 = vsel %vm939_vm2, %v2010_v51, 0.0 }
 0x2ec   :  { %v2033_v63 = vpop.xlane.xlu0 %716 }
 0x2ed   :  { %v748_v1 = vsub.f32 %v1764_v50, %v2033_v63  ;;  %v2037_v58 = vpop.xlane.xlu2 %956 }
 0x2ef   :  { %v764_v2 = vmul.f32 1.442695, %v748_v1 }
 0x2f1   :  { %1217 = vpow2.f32 %v764_v2 }
 0x2f4   :  { %v2039_v8 = vpop.xlane.xlu0 %732 }
 0x2f5   :  { %v756_v12 = vsub.f32 %v1797_v49, %v2039_v8  ;;  %v2043_v59 = vpop.xlane.xlu2 %718 }
 0x2f6   :  { %v749_v24 = vsub.f32 %v1801_v20, %v2043_v59 }
 0x2f7   :  { %v1218_v23 = vpop.eup %1217  ;;  %v780_v17 = vmul.f32 1.442695, %v756_v12 }
 0x2f8   :  { %v766_v40 = vmul.f32 1.442695, %v749_v24  ;;  %796 = vadd.xlane.f32.xlu0 %v1218_v23  ;;  %v947_v24 = vsel %vm931_vm1, %v1995_v16, 0.0 }
 0x2f9   :  { %1219 = vpow2.f32 %v780_v17 }
 0x2fa   :  { %1221 = vpow2.f32 %v766_v40 }
 0x2fc   :  { %v2047_v50 = vpop.xlane.xlu0 %958 }
 0x2fd   :  { %v2049_v42 = vpop.xlane.xlu2 %734 }
 0x2fe   :  { %v757_v43 = vsub.f32 %v1835_v28, %v2049_v42 }
 0x2ff   :  { %v1220_v38 = vpop.eup %1219 }
 0x300   :  { %v1222_v44 = vpop.eup %1221  ;;  %v782_v11 = vmul.f32 1.442695, %v757_v43  ;;  %812 = vadd.xlane.f32.xlu2 %v1220_v38 }
 0x301   :  { %798 = vadd.xlane.f32.xlu1 %v1222_v44 }
 0x302   :  { %1223 = vpow2.f32 %v782_v11 }
 0x304   :  { %v2053_v20 = vpop.xlane.xlu0 %720 }
 0x305   :  { %v750_v13 = vsub.f32 %v1842_v10, %v2053_v20  ;;  %v2057_v60 = vpop.xlane.xlu2 %722 }
 0x306   :  { %v751_v10 = vsub.f32 %v1874_v48, %v2057_v60 }
 0x307   :  { %v768_v22 = vmul.f32 1.442695, %v750_v13 }
 0x308   :  { %v1224_v30 = vpop.eup %1223  ;;  %v770_v61 = vmul.f32 1.442695, %v751_v10  ;;  %v948_v10 = vsel %vm932_vm10, %v1797_v49, 0.0  ;;  %v953_v49 = vsel %vm937_vm13, %v1972_v46, 0.0 }
 0x309   :  { %1225 = vpow2.f32 %v768_v22  ;;  %814 = vadd.xlane.f32.xlu1 %v1224_v30 }
 0x30c   :  { %v2059_v45 = vpop.xlane.xlu0 %736 }
 0x30d   :  { %v758_v19 = vsub.f32 %v1902_v21, %v2059_v45  ;;  %v2063_v25 = vpop.xlane.xlu2 %738 }
 0x30e   :  { %v759_v7 = vsub.f32 %v1912_v47, %v2063_v25 }
 0x30f   :  { %v1226_v18 = vpop.eup %1225  ;;  %v784_v27 = vmul.f32 1.442695, %v758_v19 }
 0x310   :  { %v786_v15 = vmul.f32 1.442695, %v759_v7  ;;  %800 = vadd.xlane.f32.xlu2 %v1226_v18 }
 0x311   :  { %1227 = vpow2.f32 %v784_v27 }
 0x312   :  { %1229 = vpow2.f32 %v786_v15 }
 0x313   :  { %1231 = vpow2.f32 %v770_v61  ;;  %v950_v61 = vsel %vm934_vm12, %v1902_v21, 0.0  ;;  %v920_v21 = vpop.permute.xlu1 %919 }
 0x314   :  { %v2069_v0 = vpop.xlane.xlu0 %962  ;;  %vm938_vm0 = vcmp.eq.s32.totalorder %v1715_v3, %v920_v21 }
 0x315   :  { %v2071_v31 = vpop.xlane.xlu2 %726  ;;  %v954_v29 = vsel %vm938_vm0, %v2001_v41, 0.0 }
 0x316   :  { %v753_v33 = vsub.f32 %v1939_v32, %v2071_v31 }
 0x317   :  { %v1228_v34 = vpop.eup %1227 }
 0x318   :  { %v1230_v62 = vpop.eup %1229  ;;  %v774_v4 = vmul.f32 1.442695, %v753_v33  ;;  %816 = vadd.xlane.f32.xlu0 %v1228_v34  ;;  %v949_v33 = vsel %vm933_vm11, %v1835_v28, 0.0  ;;  %v952_v28 = vsel %vm936_vm15, %v1991_v35, 0.0 }
 0x319   :  { %818 = vadd.xlane.f32.xlu2 %v1230_v62  ;;  %v1232_v53 = vpop.eup %1231 }
 0x31a   :  { %1233 = vpow2.f32 %v774_v4 }
 0x31c   :  { %v2075_v37 = vpop.xlane.xlu0 %724 }
 0x31d   :  { %v752_v48 = vsub.f32 %v1959_v14, %v2075_v37  ;;  %v2079_v39 = vpop.xlane.xlu2 %742 }
 0x31e   :  { %v761_v26 = vsub.f32 %v1972_v46, %v2079_v39  ;;  %v961_v46 = vpop.xlane.xlu1 %960 }
 0x31f   :  { %v772_v52 = vmul.f32 1.442695, %v752_v48 }
 0x320   :  { %v1234_v54 = vpop.eup %1233  ;;  %802 = vadd.xlane.f32.xlu0 %v1232_v53  ;;  %v790_v11 = vmul.f32 1.442695, %v761_v26 }
 0x321   :  { %1235 = vpow2.f32 %v772_v52  ;;  %806 = vadd.xlane.f32.xlu2 %v1234_v54 }
 0x324   :  { %v2081_v32 = vpop.xlane.xlu0 %740 }
 0x325   :  { %v760_v55 = vsub.f32 %v1991_v35, %v2081_v32  ;;  %v2085_v1 = vpop.xlane.xlu2 %730 }
 0x326   :  { %v755_v12 = vsub.f32 %v1995_v16, %v2085_v1  ;;  %v2132_v47 = vpop.xlane.xlu1 %966 }
 0x327   :  { %v1236_v2 = vpop.eup %1235  ;;  %v788_v14 = vmul.f32 1.442695, %v760_v55 }
 0x328   :  { %804 = vadd.xlane.f32.xlu1 %v1236_v2  ;;  %v778_v23 = vmul.f32 1.442695, %v755_v12 }
 0x329   :  { %1237 = vpow2.f32 %v788_v14  ;;  %970 = vadd.xlane.f32.xlu2 %v947_v24 }
 0x32a   :  { %1239 = vpow2.f32 %v778_v23 }
 0x32c   :  { %v2092_v17 = vpop.xlane.xlu0 %728 }
 0x32d   :  { %v754_v40 = vsub.f32 %v1984_v5, %v2092_v17  ;;  %v2096_v43 = vpop.xlane.xlu2 %964 }
 0x32f   :  { %v1238_v38 = vpop.eup %1237  ;;  %v776_v44 = vmul.f32 1.442695, %v754_v40 }
 0x330   :  { %820 = vadd.xlane.f32.xlu1 %v1238_v38  ;;  %v1240_v22 = vpop.eup %1239 }
 0x331   :  { %1241 = vpow2.f32 %v776_v44 }
 0x332   :  { %1243 = vpow2.f32 %v790_v11 }
 0x334   :  { %v2100_v16 = vpop.xlane.xlu0 %744 }
 0x335   :  { %v762_v13 = vsub.f32 %v2001_v41, %v2100_v16  ;;  %v2104_v5 = vpop.xlane.xlu2 %746 }
 0x336   :  { %v763_v7 = vsub.f32 %v2010_v51, %v2104_v5 }
 0x337   :  { %v1242_v30 = vpop.eup %1241  ;;  %v792_v19 = vmul.f32 1.442695, %v762_v13 }
 0x338   :  { %808 = vadd.xlane.f32.xlu0 %v1242_v30  ;;  %810 = vadd.xlane.f32.xlu1 %v1240_v22  ;;  %v1244_v18 = vpop.eup %1243  ;;  %v794_v27 = vmul.f32 1.442695, %v763_v7 }
 0x339   :  { %1245 = vpow2.f32 %v792_v19 }
 0x33a   :  { %1247 = vpow2.f32 %v794_v27 }
 0x33c   :  { %v2130_v56 = vpop.xlane.xlu0 %968 }
 0x33f   :  { %v1246_v15 = vpop.eup %1245 }
 0x340   :  { %824 = vadd.xlane.f32.xlu2 %v1246_v15  ;;  %822 = vadd.xlane.f32.xlu0 %v1244_v18  ;;  %v1248_v34 = vpop.eup %1247 }
 0x341   :  { %972 = vadd.xlane.f32.xlu1 %v948_v10 }
 0x348   :  { %976 = vadd.xlane.f32.xlu2 %v950_v61  ;;  %974 = vadd.xlane.f32.xlu0 %v949_v33 }
 0x349   :  { %826 = vadd.xlane.f32.xlu1 %v1248_v34 }
 0x350   :  { %982 = vadd.xlane.f32.xlu2 %v953_v49  ;;  %978 = vadd.xlane.f32.xlu0 %v951_v9 }
 0x351   :  { %980 = vadd.xlane.f32.xlu1 %v952_v28 }
 0x358   :  { %984 = vadd.xlane.f32.xlu0 %v954_v29 }
 0x359   :  { %986 = vadd.xlane.f32.xlu1 %v955_v57 }
 0x36b   :  { %v797_v62 = vpop.xlane.xlu0 %796 }
 0x373   :  { %v813_v35 = vpop.xlane.xlu2 %812 }
 0x374   :  { %v799_v4 = vpop.xlane.xlu1 %798 }
 0x37c   :  { %v815_v52 = vpop.xlane.xlu1 %814 }
 0x383   :  { %v801_v48 = vpop.xlane.xlu2 %800 }
 0x384   :  { %1249 = vlog2.f32 %v801_v48 }
 0x385   :  { %1251 = vlog2.f32 %v799_v4 }
 0x38a   :  { %v1250_v41 = vpop.eup %1249 }
 0x38b   :  { %v817_v53 = vpop.xlane.xlu0 %816  ;;  %v1252_v51 = vpop.eup %1251  ;;  %v833_v14 = vmul.f32 0.6931472, %v1250_v41 }
 0x38c   :  { %v819_v54 = vpop.xlane.xlu2 %818  ;;  %v831_v24 = vmul.f32 0.6931472, %v1252_v51 }
 0x38d   :  { %v862_v44 = vadd.f32 %v833_v14, %v2053_v20 }
 0x38e   :  { %v861_v13 = vadd.f32 %v831_v24, %v2043_v59 }
 0x38f   :  { %v990_v7 = vsub.f32 %v862_v44, %v961_v46 }
 0x390   :  { %v989_v27 = vsub.f32 %v861_v13, %v2047_v50 }
 0x391   :  { %v1071_v33 = vmul.f32 0.0, %v990_v7 }
 0x393   :  { %v803_v55 = vpop.xlane.xlu0 %802  ;;  %v1089_v49 = vsel %vm1085_vm3, %v1071_v33, 0.0 }
 0x394   :  { %1253 = vlog2.f32 %v803_v55  ;;  %v807_v36 = vpop.xlane.xlu2 %806 }
 0x395   :  { %1255 = vlog2.f32 %v797_v62 }
 0x39a   :  { %v1254_v2 = vpop.eup %1253 }
 0x39b   :  { %v805_v3 = vpop.xlane.xlu1 %804  ;;  %v1256_v12 = vpop.eup %1255  ;;  %v835_v23 = vmul.f32 0.6931472, %v1254_v2 }
 0x39c   :  { %1257 = vlog2.f32 %v805_v3  ;;  %v829_v38 = vmul.f32 0.6931472, %v1256_v12  ;;  %v971_v61 = vpop.xlane.xlu2 %970 }
 0x39d   :  { %1259 = vlog2.f32 %v807_v36  ;;  %v863_v22 = vadd.f32 %v835_v23, %v2057_v60 }
 0x39e   :  { %v860_v19 = vadd.f32 %v829_v38, %v2033_v63  ;;  %1261 = vlog2.f32 %v813_v35  ;;  %v1087_v63 = vsel %vm1085_vm3, %v989_v27, 0.0 }
 0x39f   :  { %v991_v15 = vsub.f32 %v863_v22, %v2069_v0  ;;  %1263 = vlog2.f32 %v815_v52 }
 0x3a0   :  { %v988_v20 = vsub.f32 %v860_v19, %v2037_v58 }
 0x3a2   :  { %v1258_v40 = vpop.eup %1257  ;;  %v1086_v0 = vsel %vm1085_vm3, %v988_v20, 0.0 }
 0x3a3   :  { %v837_v26 = vmul.f32 0.6931472, %v1258_v40  ;;  %v821_v11 = vpop.xlane.xlu1 %820  ;;  %v1260_v30 = vpop.eup %1259  ;;  %v1088_v9 = vadd.f32 %v1087_v63, %v1086_v0 }
 0x3a4   :  { %v839_v10 = vmul.f32 0.6931472, %v1260_v30  ;;  %v1262_v50 = vpop.eup %1261 }
 0x3a5   :  { %v864_v18 = vadd.f32 %v837_v26, %v2075_v37  ;;  %v1072_v37 = vmul.f32 0.0, %v991_v15  ;;  %v1264_v28 = vpop.eup %1263  ;;  %v1090_v46 = vadd.f32 %v1089_v49, %v1088_v9 }
 0x3a6   :  { %v865_v6 = vadd.f32 %v839_v10, %v2071_v31  ;;  %v847_v2 = vmul.f32 0.6931472, %v1264_v28 }
 0x3a7   :  { %v992_v59 = vsub.f32 %v864_v18, %v2096_v43  ;;  %v845_v43 = vmul.f32 0.6931472, %v1262_v50  ;;  %v1091_v21 = vsel %vm1085_vm3, %v1072_v37, 0.0 }
 0x3a8   :  { %v993_v29 = vsub.f32 %v865_v6, %v2132_v47  ;;  %v1092_v52 = vadd.f32 %v1091_v21, %v1090_v46 }
 0x3a9   :  { %v1073_v58 = vmul.f32 0.0, %v992_v59  ;;  %v868_v36 = vadd.f32 %v845_v43, %v2039_v8 }
 0x3aa   :  { %v1074_v41 = vmul.f32 0.0, %v993_v29 }
 0x3ab   :  { %v809_v60 = vpop.xlane.xlu0 %808  ;;  %v811_v34 = vpop.xlane.xlu1 %810  ;;  %v1093_v31 = vsel %vm1085_vm3, %v1073_v58, 0.0 }
 0x3ac   :  { %1265 = vlog2.f32 %v809_v60  ;;  %v1094_v47 = vadd.f32 %v1093_v31, %v1092_v52  ;;  %v1095_v40 = vsel %vm1085_vm3, %v1074_v41, 0.0 }
 0x3ad   :  { %1267 = vlog2.f32 %v811_v34 }
 0x3ae   :  { %1269 = vlog2.f32 %v817_v53  ;;  %v1096_v13 = vadd.f32 %v1095_v40, %v1094_v47 }
 0x3af   :  { %1271 = vlog2.f32 %v819_v54 }
 0x3b0   :  { %1273 = vlog2.f32 %v821_v11 }
 0x3b2   :  { %v1266_v57 = vpop.eup %1265 }
 0x3b3   :  { %v1268_v35 = vpop.eup %1267  ;;  %v841_v62 = vmul.f32 0.6931472, %v1266_v57  ;;  %v823_v4 = vpop.xlane.xlu0 %822 }
 0x3b4   :  { %v825_v48 = vpop.xlane.xlu2 %824  ;;  %v843_v55 = vmul.f32 0.6931472, %v1268_v35  ;;  %v973_v53 = vpop.xlane.xlu1 %972  ;;  %1275 = vlog2.f32 %v823_v4 }
 0x3b5   :  { %v1270_v3 = vpop.eup %1269  ;;  %v866_v51 = vadd.f32 %v841_v62, %v2092_v17  ;;  %v996_v24 = vsub.f32 %v868_v36, %v973_v53  ;;  %v869_v17 = vadd.f32 %v847_v2, %v2049_v42  ;;  %1277 = vlog2.f32 %v825_v48 }
 0x3b6   :  { %v867_v14 = vadd.f32 %v843_v55, %v2085_v1  ;;  %v849_v23 = vmul.f32 0.6931472, %v1270_v3  ;;  %v1272_v44 = vpop.eup %1271 }
 0x3b7   :  { %v994_v12 = vsub.f32 %v866_v51, %v2130_v56  ;;  %v1077_v22 = vmul.f32 0.0, %v996_v24  ;;  %v1274_v1 = vpop.eup %1273  ;;  %v851_v15 = vmul.f32 0.6931472, %v1272_v44 }
 0x3b8   :  { %v995_v54 = vsub.f32 %v867_v14, %v971_v61  ;;  %v870_v7 = vadd.f32 %v849_v23, %v2059_v45  ;;  %v853_v42 = vmul.f32 0.6931472, %v1274_v1 }
 0x3b9   :  { %v1075_v38 = vmul.f32 0.0, %v994_v12  ;;  %v1101_v59 = vsel %vm1085_vm3, %v1077_v22, 0.0  ;;  %v871_v45 = vadd.f32 %v851_v15, %v2063_v25 }
 0x3ba   :  { %v1076_v26 = vmul.f32 0.0, %v995_v54  ;;  %v1276_v27 = vpop.eup %1275  ;;  %v872_v58 = vadd.f32 %v853_v42, %v2081_v32 }
 0x3bb   :  { %v1097_v8 = vsel %vm1085_vm3, %v1075_v38, 0.0  ;;  %v975_v11 = vpop.xlane.xlu0 %974  ;;  %v855_v60 = vmul.f32 0.6931472, %v1276_v27  ;;  %v1278_v6 = vpop.eup %1277 }
 0x3bc   :  { %v977_v30 = vpop.xlane.xlu2 %976  ;;  %v1098_v19 = vadd.f32 %v1097_v8, %v1096_v13  ;;  %v997_v56 = vsub.f32 %v869_v17, %v975_v11  ;;  %v827_v18 = vpop.xlane.xlu1 %826  ;;  %v1099_v10 = vsel %vm1085_vm3, %v1076_v26, 0.0  ;;  %v857_v57 = vmul.f32 0.6931472, %v1278_v6 }
 0x3bd   :  { %v998_v33 = vsub.f32 %v870_v7, %v977_v30  ;;  %1279 = vlog2.f32 %v827_v18  ;;  %v873_v28 = vadd.f32 %v855_v60, %v2079_v39 }
 0x3be   :  { %v1100_v61 = vadd.f32 %v1099_v10, %v1098_v19  ;;  %v1078_v20 = vmul.f32 0.0, %v997_v56  ;;  %v874_v53 = vadd.f32 %v857_v57, %v2100_v16 }
 0x3bf   :  { %v1079_v37 = vmul.f32 0.0, %v998_v33 }
 0x3c0   :  { %v1102_v34 = vadd.f32 %v1101_v59, %v1100_v61  ;;  %v1103_v63 = vsel %vm1085_vm3, %v1078_v20, 0.0 }
 0x3c1   :  { %v1105_v46 = vsel %vm1085_vm3, %v1079_v37, 0.0 }
 0x3c2   :  { %v1104_v50 = vadd.f32 %v1103_v63, %v1102_v34 }
 0x3c3   :  { %v979_v49 = vpop.xlane.xlu0 %978  ;;  %v1280_v9 = vpop.eup %1279 }
 0x3c4   :  { %v983_v0 = vpop.xlane.xlu2 %982  ;;  %v999_v43 = vsub.f32 %v871_v45, %v979_v49  ;;  %v981_v21 = vpop.xlane.xlu1 %980  ;;  %v1106_v62 = vadd.f32 %v1105_v46, %v1104_v50  ;;  %v859_v4 = vmul.f32 0.6931472, %v1280_v9 }
 0x3c5   :  { %v1000_v29 = vsub.f32 %v872_v58, %v981_v21  ;;  %v1001_v35 = vsub.f32 %v873_v28, %v983_v0 }
 0x3c6   :  { %v1080_v31 = vmul.f32 0.0, %v999_v43  ;;  %v875_v41 = vadd.f32 %v859_v4, %v2104_v5 }
 0x3c7   :  { %v1081_v25 = vmul.f32 0.0, %v1000_v29  ;;  %v1082_v55 = vmul.f32 0.0, %v1001_v35 }
 0x3c8   :  { %v1107_v48 = vsel %vm1085_vm3, %v1080_v31, 0.0 }
 0x3c9   :  { %v1108_v52 = vadd.f32 %v1107_v48, %v1106_v62  ;;  %v1109_v32 = vsel %vm1085_vm3, %v1081_v25, 0.0  ;;  %v1111_v47 = vsel %vm1085_vm3, %v1082_v55, 0.0 }
 0x3cb   :  { %v1110_v39 = vadd.f32 %v1109_v32, %v1108_v52  ;;  %v985_v3 = vpop.xlane.xlu0 %984 }
 0x3cc   :  { %v1002_v51 = vsub.f32 %v874_v53, %v985_v3  ;;  %v987_v36 = vpop.xlane.xlu1 %986 }
 0x3cd   :  { %v1003_v2 = vsub.f32 %v875_v41, %v987_v36  ;;  %v1112_v24 = vadd.f32 %v1111_v47, %v1110_v39 }
 0x3ce   :  { %v1083_v14 = vmul.f32 0.0, %v1002_v51 }
 0x3cf   :  { %v1084_v12 = vmul.f32 0.0, %v1003_v2 }
 0x3d0   :  { %v1113_v23 = vsel %vm1085_vm3, %v1083_v14, 0.0 }
 0x3d1   :  { %v1114_v54 = vadd.f32 %v1113_v23, %v1112_v24  ;;  %v1115_v40 = vsel %vm1085_vm3, %v1084_v12, 0.0 }
 0x3d3   :  { %v1116_v38 = vadd.f32 %v1115_v40, %v1114_v54 }
 0x3d5   :  { %1117 = vadd.xlane.f32.xlu2 %v1116_v38 }
 0x448   :  { %v1118_v16 = vpop.xlane.xlu2 %1117 }
 0x449   :  { %v1119_v44 = vrot.slane %v1118_v16, 4 }
 0x44b   :  { %v1120_v26 = vadd.f32 %v1119_v44, %v1118_v16 }
 0x44d   :  { %v1121_v13 = vrot.slane %v1120_v26, 2 }
 0x44f   :  { %v1122_v5 = vadd.f32 %v1121_v13, %v1120_v26 }
 0x451   :  { %v1123_v17 = vrot.slane %v1122_v5, 1 }
 0x453   :  { %v1124_v8 = vadd.f32 %v1123_v17, %v1122_v5 }
 0x455   :  { %1178 = vpush %v1124_v8 }
 0x486   :  { %s1179_s10 = spop %1178 }
 0x487   :  { %v1126_v22 = vstv %s1179_s10 }
 0x488   :  { %v1127_v11 = vmul.f32 0.0625, %v1126_v22 }
 0x48a   :  { %1129 = vst.msk [vmem:[#allocation2] sm:$0x1] %vm1128_vm4, %v1127_v11 }
 0x48b   :  { %1140 = dma.vmem_to_hbm [thread:$0]  %s1136_s6, 16, %s1138_s9, [#allocation3]  }
 0x48c   :  { %1305 = dma.done.wait [#allocation3], 16  }
 0x48d   :  { %1306 = vsyncadd [#allocation3], 4294967280 }
 0x48e   :  { %1145 = vsyncpa [#allocation3], 1 }

</bundles_post_ra>
